<compile_context>
chip_gen: v7x
topology: tpu7x:2x2x1
jax: 0.10.0
libtpu: 0.0.40
codegen_flags: <defaults>
</compile_context>

<pallas_src>
import functools

import jax
import jax.numpy as jnp
from jax.experimental import pallas as pl
from jax.experimental.pallas import tpu as pltpu

HIDDEN = 32
NUM_HEADS = 8
NEG_INF = -1000000000.0


def _cross_attn_kernel(s1_ref, s2_ref, bias_ref,
                       wq_ref, bq_ref, wkv_ref, bkv_ref, wo_ref, bo_ref,
                       out_ref,
                       *, num_heads, head_dim, batch_block, seq_len, hidden):
    nH, d, bt, S, H = num_heads, head_dim, batch_block, seq_len, hidden
    M = bt * S

    # (bt, S, H) -> (M, H): layout-free merge (S is a full sublane tile here).
    s1 = s1_ref[...].reshape(M, H)
    s2 = s2_ref[...].reshape(M, H)

    # Projections.  Wq/bq arrive pre-scaled by 1/sqrt(d); K and V share one fused
    # (H, 2H) matmul since both consume stream2.
    q = jnp.dot(s1, wq_ref[...], preferred_element_type=jnp.float32) + bq_ref[...]
    kv = jnp.dot(s2, wkv_ref[...], preferred_element_type=jnp.float32) + bkv_ref[...]

    def to_heads(x):
        # (M, nH*d) -> (bt*nH, S, d): one reshape + one minor-dim-preserving
        # transpose per tensor (replaces the old 8-way lane-slice + concatenate).
        x4 = x.reshape(bt, S, nH, d)
        return jnp.transpose(x4, (0, 2, 1, 3)).reshape(bt * nH, S, d)

    qh = to_heads(q)
    kh = to_heads(kv[:, :H])
    vh = to_heads(kv[:, H:])

    # Scores for every (batch, head) in one batched contraction; the trailing d is
    # contracted, so no explicit K transpose.
    scores = jnp.einsum('bqd,bkd->bqk', qh, kh,
                        preferred_element_type=jnp.float32)          # (bt*nH, S, S)

    # Additive key-position mask (0 keep / NEG_INF drop).  The leading-dim reshape
    # is free and the add broadcasts over heads and query rows -- no compare /
    # select pair, no materialized nH-fold broadcast.
    bias = bias_ref[...]                                             # (bt, S)
    scores = (scores.reshape(bt, nH, S, S)
              + bias[:, None, None, :]).reshape(bt * nH, S, S)

    # Softmax over keys; normalization deferred to after the PV contraction so the
    # divide touches (.., S, d) instead of (.., S, S).
    m = jnp.max(scores, axis=-1, keepdims=True)
    e = jnp.exp(scores - m)
    denom = jnp.sum(e, axis=-1, keepdims=True)

    ctx = jnp.einsum('bqk,bkd->bqd', e, vh,
                     preferred_element_type=jnp.float32)             # (bt*nH, S, d)
    # Exact reciprocal keeps the 1e-4 numerical match with the reference.
    ctx = ctx * pl.reciprocal(denom, approx=False)

    # (bt*nH, S, d) -> (M, H), column order h*d + dd (== torch transpose+view),
    # then one wide output projection.
    ctx_flat = jnp.transpose(ctx.reshape(bt, nH, S, d), (0, 2, 1, 3)).reshape(M, H)
    out = jnp.dot(ctx_flat, wo_ref[...], preferred_element_type=jnp.float32) + bo_ref[...]

    out_ref[...] = out.reshape(bt, S, H).astype(out_ref.dtype)


def _pick_batch_block(B, S):
    """Batch items processed per grid step."""
    # ~1024 rows per step amortizes the ~0.35us/step pipeline overhead.
    bt = max(1, 1024 // max(S, 1))
    # Lane-padding-aware VMEM model: with S and head_dim < 128, every per-(batch,
    # head) attention intermediate (q/k/v heads, scores, exp, stats, ctx) occupies
    # full (8,128) vregs -- roughly 48 vregs (~192 KiB) per batch item.  Budget
    # ~12 MiB for them so a step fits scoped VMEM on every generation (incl. v7x).
    per_item_bytes = 48 * 8 * 128 * 4
    bt = min(bt, max(1, (12 << 20) // per_item_bytes))
    # v7x has 2 TensorCores: keep >= 2 parallel grid steps when the batch allows.
    if B >= 16:
        bt = min(bt, B // 2)
    bt = min(bt, B)
    if bt >= 8:
        bt -= bt % 8          # sublane-aligned batch blocks
    return max(bt, 1)


def cross_stream_attention(stream1, stream2, attention_mask, params,
                           num_heads=NUM_HEADS, batch_block=None):
    B, S, H = stream1.shape
    head_dim = H // num_heads

    wq, bq, wk, bk, wv, bv, wo, bo = params  # w*: (H,H) pre-transposed, b*: (1,H)

    # Fold 1/sqrt(d) into the Q projection (one-time weight pre-scaling).
    scale = 1.0 / (head_dim ** 0.5)
    wq_s = wq * scale
    bq_s = bq * scale

    # Fuse the K and V projections (both consume stream2) into one (H, 2H) matmul.
    wkv = jnp.concatenate([wk, wv], axis=1)   # (H, 2H)
    bkv = jnp.concatenate([bk, bv], axis=1)   # (1, 2H)

    # Additive mask bias: 0.0 where attended, NEG_INF where masked (robust >0.5
    # test instead of an exact ==0.0 float compare).
    if attention_mask is None:
        attention_mask = jnp.ones((B, S), jnp.float32)
    bias = jnp.where(attention_mask > 0.5, 0.0, NEG_INF).astype(jnp.float32)

    # --- batch block selection + hardening -----------------------------------
    if batch_block is None:
        bt = _pick_batch_block(B, S)
    else:
        bt = max(1, min(int(batch_block), B))
        if bt < B and bt % 8 != 0:
            # keep the (8,128) sublane constraint on the (bt, S) bias block
            bt = min(B, max(8, (bt // 8) * 8))

    n_blocks = -(-B // bt)
    if batch_block is None and n_blocks > 1:
        # Re-balance so padding is minimal, staying sublane-aligned.
        bt = -(-B // n_blocks)
        bt = -(-bt // 8) * 8
    B_pad = n_blocks * bt

    if B_pad != B:
        pad = B_pad - B
        stream1 = jnp.pad(stream1, ((0, pad), (0, 0), (0, 0)))
        stream2 = jnp.pad(stream2, ((0, pad), (0, 0), (0, 0)))
        bias = jnp.pad(bias, ((0, pad), (0, 0)))   # padded rows fully attended -> no NaNs
    # --------------------------------------------------------------------------

    kernel = functools.partial(
        _cross_attn_kernel, num_heads=num_heads, head_dim=head_dim,
        batch_block=bt, seq_len=S, hidden=H)

    x_spec = pl.BlockSpec((bt, S, H), lambda i: (i, 0, 0))
    bias_spec = pl.BlockSpec((bt, S), lambda i: (i, 0))
    wq_spec = pl.BlockSpec((H, H), lambda i: (0, 0))
    bq_spec = pl.BlockSpec((1, H), lambda i: (0, 0))
    wkv_spec = pl.BlockSpec((H, 2 * H), lambda i: (0, 0))
    bkv_spec = pl.BlockSpec((1, 2 * H), lambda i: (0, 0))
    wo_spec = pl.BlockSpec((H, H), lambda i: (0, 0))
    bo_spec = pl.BlockSpec((1, H), lambda i: (0, 0))

    out = pl.pallas_call(
        kernel,
        out_shape=jax.ShapeDtypeStruct((B_pad, S, H), stream1.dtype),
        grid_spec=pltpu.PrefetchScalarGridSpec(
            num_scalar_prefetch=0,
            grid=(n_blocks,),
            in_specs=[x_spec, x_spec, bias_spec,
                      wq_spec, bq_spec, wkv_spec, bkv_spec,
                      wo_spec, bo_spec],
            out_specs=x_spec,
        ),
        compiler_params=pltpu.CompilerParams(
            dimension_semantics=("parallel",),
            vmem_limit_bytes=32 << 20),
    )(stream1, stream2, bias, wq_s, bq_s, wkv, bkv, wo, bo)

    return out[:B] if B_pad != B else out


def reference(stream1, stream2, attention_mask, params, num_heads=NUM_HEADS):
    """Pure-JAX reference reproducing the PyTorch forward."""
    B, S, H = stream1.shape
    d = H // num_heads
    wq, bq, wk, bk, wv, bv, wo, bo = params

    def proj(x, w, b):
        return x @ w + b  # w already (H_in, H_out)

    q = proj(stream1, wq, bq).reshape(B, S, num_heads, d).transpose(0, 2, 1, 3)
    k = proj(stream2, wk, bk).reshape(B, S, num_heads, d).transpose(0, 2, 1, 3)
    v = proj(stream2, wv, bv).reshape(B, S, num_heads, d).transpose(0, 2, 1, 3)

    scores = jnp.einsum("bhqd,bhkd->bhqk", q, k) / (d ** 0.5)
    m = attention_mask[:, None, None, :]
    scores = jnp.where(m == 0.0, NEG_INF, scores)
    attn = jax.nn.softmax(scores, axis=-1)
    ctx = jnp.einsum("bhqk,bhkd->bhqd", attn, v)
    ctx = ctx.transpose(0, 2, 1, 3).reshape(B, S, H)
    return ctx @ wo + bo


def init_params(key, hidden):
    # Deterministic synthetic weights (shapes match nn.Linear(hidden, hidden)),
    # stored pre-transposed as (H_in, H_out); biases as (1, H).
    ks = jax.random.split(key, 8)
    scale = 1.0 / (hidden ** 0.5)
    wq = jax.random.uniform(ks[0], (hidden, hidden), jnp.float32, -scale, scale)
    bq = jax.random.uniform(ks[1], (1, hidden), jnp.float32, -scale, scale)
    wk = jax.random.uniform(ks[2], (hidden, hidden), jnp.float32, -scale, scale)
    bk = jax.random.uniform(ks[3], (1, hidden), jnp.float32, -scale, scale)
    wv = jax.random.uniform(ks[4], (hidden, hidden), jnp.float32, -scale, scale)
    bv = jax.random.uniform(ks[5], (1, hidden), jnp.float32, -scale, scale)
    wo = jax.random.uniform(ks[6], (hidden, hidden), jnp.float32, -scale, scale)
    bo = jax.random.uniform(ks[7], (1, hidden), jnp.float32, -scale, scale)
    return (wq, bq, wk, bk, wv, bv, wo, bo)


if __name__ == "__main__":
    B, S, H = 2, 8, HIDDEN

    root = jax.random.PRNGKey(0)
    k1, k2, k3, kp = jax.random.split(root, 4)

    stream1 = jax.random.normal(k1, (B, S, H), jnp.float32)
    stream2 = jax.random.normal(k2, (B, S, H), jnp.float32)
    # mask: 1.0 = attend, 0.0 = masked out; mask the last 2 key positions of batch 1
    attention_mask = jnp.ones((B, S), jnp.float32)
    attention_mask = attention_mask.at[1, -2:].set(0.0)

    params = init_params(kp, H)

    out = cross_stream_attention(stream1, stream2, attention_mask, params)
    out = jax.block_until_ready(out)

    ref = reference(stream1, stream2, attention_mask, params)
    assert out.shape == (B, S, H)
    assert jnp.allclose(out, ref, atol=1e-4, rtol=1e-4), "mismatch vs reference"

    print("KERNEL_OK")
</pallas_src>

<mosaic_0001>
module attributes {stable_mosaic.version = 11 : i64} {
  func.func @_cross_attn_kernel(%arg0: i32, %arg1: memref<2x8x32xf32, #tpu.memory_space<vmem>>, %arg2: memref<2x8x32xf32, #tpu.memory_space<vmem>>, %arg3: memref<2x8xf32, #tpu.memory_space<vmem>>, %arg4: memref<32x32xf32, #tpu.memory_space<vmem>>, %arg5: memref<1x32xf32, #tpu.memory_space<vmem>>, %arg6: memref<32x64xf32, #tpu.memory_space<vmem>>, %arg7: memref<1x64xf32, #tpu.memory_space<vmem>>, %arg8: memref<32x32xf32, #tpu.memory_space<vmem>>, %arg9: memref<1x32xf32, #tpu.memory_space<vmem>>, %arg10: memref<2x8x32xf32, #tpu.memory_space<vmem>>) attributes {dimension_semantics = [#tpu.dimension_semantics<parallel>], iteration_bounds = array<i64: 1>, scalar_prefetch = 0 : i64, scratch_operands = 0 : i64, tpu.core_type = #tpu.core_type<tc>, window_params = [{transform_indices = @transform_0, window_bounds = array<i64: 2, 8, 32>}, {transform_indices = @transform_1, window_bounds = array<i64: 2, 8, 32>}, {transform_indices = @transform_2, window_bounds = array<i64: 2, 8>}, {pipeline_mode = #tpu.pipeline_mode<synchronous>, transform_indices = @transform_3, window_bounds = array<i64: 32, 32>}, {pipeline_mode = #tpu.pipeline_mode<synchronous>, transform_indices = @transform_4, window_bounds = array<i64: 1, 32>}, {pipeline_mode = #tpu.pipeline_mode<synchronous>, transform_indices = @transform_5, window_bounds = array<i64: 32, 64>}, {pipeline_mode = #tpu.pipeline_mode<synchronous>, transform_indices = @transform_6, window_bounds = array<i64: 1, 64>}, {pipeline_mode = #tpu.pipeline_mode<synchronous>, transform_indices = @transform_7, window_bounds = array<i64: 32, 32>}, {pipeline_mode = #tpu.pipeline_mode<synchronous>, transform_indices = @transform_8, window_bounds = array<i64: 1, 32>}, {transform_indices = @transform_9, window_bounds = array<i64: 2, 8, 32>}]} {
    %c0 = arith.constant 0 : index
    %c0_0 = arith.constant 0 : index
    %c0_1 = arith.constant 0 : index
    %0 = vector.load %arg1[%c0, %c0_0, %c0_1] : memref<2x8x32xf32, #tpu.memory_space<vmem>>, vector<2x8x32xf32>
    %1 = vector.shape_cast %0 : vector<2x8x32xf32> to vector<16x32xf32>
    %c0_2 = arith.constant 0 : index
    %c0_3 = arith.constant 0 : index
    %c0_4 = arith.constant 0 : index
    %2 = vector.load %arg2[%c0_2, %c0_3, %c0_4] : memref<2x8x32xf32, #tpu.memory_space<vmem>>, vector<2x8x32xf32>
    %3 = vector.shape_cast %2 : vector<2x8x32xf32> to vector<16x32xf32>
    %c0_5 = arith.constant 0 : index
    %c0_6 = arith.constant 0 : index
    %4 = vector.load %arg4[%c0_5, %c0_6] : memref<32x32xf32, #tpu.memory_space<vmem>>, vector<32x32xf32>
    %cst = arith.constant dense<0.000000e+00> : vector<16x32xf32>
    %5 = tpu.matmul %1, %4, %cst {dimension_numbers = #tpu.dot_dimension_numbers<[1], [0], [0], [1], [0, 0, 1, 1], [], []>} : vector<16x32xf32>, vector<32x32xf32>, vector<16x32xf32> -> vector<16x32xf32>
    %c0_7 = arith.constant 0 : index
    %c0_8 = arith.constant 0 : index
    %6 = vector.load %arg5[%c0_7, %c0_8] : memref<1x32xf32, #tpu.memory_space<vmem>>, vector<1x32xf32>
    %7 = vector.broadcast %6 : vector<1x32xf32> to vector<16x32xf32>
    %8 = arith.addf %5, %7 : vector<16x32xf32>
    %c0_9 = arith.constant 0 : index
    %c0_10 = arith.constant 0 : index
    %9 = vector.load %arg6[%c0_9, %c0_10] : memref<32x64xf32, #tpu.memory_space<vmem>>, vector<32x64xf32>
    %cst_11 = arith.constant dense<0.000000e+00> : vector<16x64xf32>
    %10 = tpu.matmul %3, %9, %cst_11 {dimension_numbers = #tpu.dot_dimension_numbers<[1], [0], [0], [1], [0, 0, 1, 1], [], []>} : vector<16x32xf32>, vector<32x64xf32>, vector<16x64xf32> -> vector<16x64xf32>
    %c0_12 = arith.constant 0 : index
    %c0_13 = arith.constant 0 : index
    %11 = vector.load %arg7[%c0_12, %c0_13] : memref<1x64xf32, #tpu.memory_space<vmem>>, vector<1x64xf32>
    %12 = vector.broadcast %11 : vector<1x64xf32> to vector<16x64xf32>
    %13 = arith.addf %10, %12 : vector<16x64xf32>
    %14 = vector.shape_cast %8 : vector<16x32xf32> to vector<2x8x8x4xf32>
    %15 = tpu.transpose %14, [0, 2, 1, 3] : vector<2x8x8x4xf32> -> vector<2x8x8x4xf32>
    %16 = vector.shape_cast %15 : vector<2x8x8x4xf32> to vector<16x8x4xf32>
    %17 = vector.extract_strided_slice %13 {offsets = [0, 0], sizes = [16, 32], strides = [1, 1]} : vector<16x64xf32> to vector<16x32xf32>
    %18 = vector.shape_cast %17 : vector<16x32xf32> to vector<2x8x8x4xf32>
    %19 = tpu.transpose %18, [0, 2, 1, 3] : vector<2x8x8x4xf32> -> vector<2x8x8x4xf32>
    %20 = vector.shape_cast %19 : vector<2x8x8x4xf32> to vector<16x8x4xf32>
    %21 = vector.extract_strided_slice %13 {offsets = [0, 32], sizes = [16, 32], strides = [1, 1]} : vector<16x64xf32> to vector<16x32xf32>
    %22 = vector.shape_cast %21 : vector<16x32xf32> to vector<2x8x8x4xf32>
    %23 = tpu.transpose %22, [0, 2, 1, 3] : vector<2x8x8x4xf32> -> vector<2x8x8x4xf32>
    %24 = vector.shape_cast %23 : vector<2x8x8x4xf32> to vector<16x8x4xf32>
    "tpu.trace_start"() <{level = 10 : i32, message = "bqd,bkd->bqk"}> : () -> ()
    %cst_14 = arith.constant dense<0.000000e+00> : vector<16x8x8xf32>
    %25 = tpu.matmul %16, %20, %cst_14 {dimension_numbers = #tpu.dot_dimension_numbers<[2], [2], [1], [1], [0, 0, 0, 1, 1, 1], [0], [0]>} : vector<16x8x4xf32>, vector<16x8x4xf32>, vector<16x8x8xf32> -> vector<16x8x8xf32>
    "tpu.trace_stop"() : () -> ()
    %c0_15 = arith.constant 0 : index
    %c0_16 = arith.constant 0 : index
    %26 = vector.load %arg3[%c0_15, %c0_16] : memref<2x8xf32, #tpu.memory_space<vmem>>, vector<2x8xf32>
    %27 = vector.shape_cast %25 : vector<16x8x8xf32> to vector<2x8x8x8xf32>
    %28 = vector.shape_cast %26 : vector<2x8xf32> to vector<2x1x1x8xf32>
    %29 = vector.broadcast %28 : vector<2x1x1x8xf32> to vector<2x8x8x8xf32>
    %30 = arith.addf %27, %29 : vector<2x8x8x8xf32>
    %31 = vector.shape_cast %30 : vector<2x8x8x8xf32> to vector<16x8x8xf32>
    %cst_17 = arith.constant dense<0xFF800000> : vector<16x8xf32>
    %32 = vector.multi_reduction <maximumf>, %31, %cst_17 [2] : vector<16x8x8xf32> to vector<16x8xf32>
    %33 = vector.shape_cast %32 : vector<16x8xf32> to vector<16x8x1xf32>
    %34 = vector.broadcast %33 : vector<16x8x1xf32> to vector<16x8x8xf32>
    %35 = arith.subf %31, %34 : vector<16x8x8xf32>
    %36 = math.exp %35 : vector<16x8x8xf32>
    %cst_18 = arith.constant dense<0.000000e+00> : vector<16x8xf32>
    %37 = vector.multi_reduction <add>, %36, %cst_18 [2] : vector<16x8x8xf32> to vector<16x8xf32>
    %38 = vector.shape_cast %37 : vector<16x8xf32> to vector<16x8x1xf32>
    "tpu.trace_start"() <{level = 10 : i32, message = "bqk,bkd->bqd"}> : () -> ()
    %cst_19 = arith.constant dense<0.000000e+00> : vector<16x8x4xf32>
    %39 = tpu.matmul %36, %24, %cst_19 {dimension_numbers = #tpu.dot_dimension_numbers<[2], [1], [1], [2], [0, 0, 0, 1, 1, 2], [0], [0]>} : vector<16x8x8xf32>, vector<16x8x4xf32>, vector<16x8x4xf32> -> vector<16x8x4xf32>
    "tpu.trace_stop"() : () -> ()
    %40 = tpu.reciprocal %38 : vector<16x8x1xf32> -> vector<16x8x1xf32>
    %41 = vector.broadcast %40 : vector<16x8x1xf32> to vector<16x8x4xf32>
    %42 = arith.mulf %39, %41 : vector<16x8x4xf32>
    %43 = vector.shape_cast %42 : vector<16x8x4xf32> to vector<2x8x8x4xf32>
    %44 = tpu.transpose %43, [0, 2, 1, 3] : vector<2x8x8x4xf32> -> vector<2x8x8x4xf32>
    %45 = vector.shape_cast %44 : vector<2x8x8x4xf32> to vector<16x32xf32>
    %c0_20 = arith.constant 0 : index
    %c0_21 = arith.constant 0 : index
    %46 = vector.load %arg8[%c0_20, %c0_21] : memref<32x32xf32, #tpu.memory_space<vmem>>, vector<32x32xf32>
    %cst_22 = arith.constant dense<0.000000e+00> : vector<16x32xf32>
    %47 = tpu.matmul %45, %46, %cst_22 {dimension_numbers = #tpu.dot_dimension_numbers<[1], [0], [0], [1], [0, 0, 1, 1], [], []>} : vector<16x32xf32>, vector<32x32xf32>, vector<16x32xf32> -> vector<16x32xf32>
    %c0_23 = arith.constant 0 : index
    %c0_24 = arith.constant 0 : index
    %48 = vector.load %arg9[%c0_23, %c0_24] : memref<1x32xf32, #tpu.memory_space<vmem>>, vector<1x32xf32>
    %49 = vector.broadcast %48 : vector<1x32xf32> to vector<16x32xf32>
    %50 = arith.addf %47, %49 : vector<16x32xf32>
    %51 = vector.shape_cast %50 : vector<16x32xf32> to vector<2x8x32xf32>
    %c0_25 = arith.constant 0 : index
    %c0_26 = arith.constant 0 : index
    %c0_27 = arith.constant 0 : index
    %52 = vector.load %arg10[%c0_25, %c0_26, %c0_27] : memref<2x8x32xf32, #tpu.memory_space<vmem>>, vector<2x8x32xf32>
    tpu.vector_store %arg10[%c0_25, %c0_26, %c0_27], %51 {strides = array<i32>} : memref<2x8x32xf32, #tpu.memory_space<vmem>>, vector<2x8x32xf32>,
    return
  }
  func.func @transform_0(%arg0: i32) -> (i32, i32, i32) {
    %c0_i32 = arith.constant 0 : i32
    %c0_i32_0 = arith.constant 0 : i32
    %c0_i32_1 = arith.constant 0 : i32
    return %arg0, %c0_i32, %c0_i32_0 : i32, i32, i32
  }
  func.func @transform_1(%arg0: i32) -> (i32, i32, i32) {
    %c0_i32 = arith.constant 0 : i32
    %c0_i32_0 = arith.constant 0 : i32
    %c0_i32_1 = arith.constant 0 : i32
    return %arg0, %c0_i32, %c0_i32_0 : i32, i32, i32
  }
  func.func @transform_2(%arg0: i32) -> (i32, i32) {
    %c0_i32 = arith.constant 0 : i32
    %c0_i32_0 = arith.constant 0 : i32
    return %arg0, %c0_i32 : i32, i32
  }
  func.func @transform_3(%arg0: i32) -> (i32, i32) {
    %c0_i32 = arith.constant 0 : i32
    %c0_i32_0 = arith.constant 0 : i32
    %c0_i32_1 = arith.constant 0 : i32
    return %c0_i32, %c0_i32_0 : i32, i32
  }
  func.func @transform_4(%arg0: i32) -> (i32, i32) {
    %c0_i32 = arith.constant 0 : i32
    %c0_i32_0 = arith.constant 0 : i32
    %c0_i32_1 = arith.constant 0 : i32
    return %c0_i32, %c0_i32_0 : i32, i32
  }
  func.func @transform_5(%arg0: i32) -> (i32, i32) {
    %c0_i32 = arith.constant 0 : i32
    %c0_i32_0 = arith.constant 0 : i32
    %c0_i32_1 = arith.constant 0 : i32
    return %c0_i32, %c0_i32_0 : i32, i32
  }
  func.func @transform_6(%arg0: i32) -> (i32, i32) {
    %c0_i32 = arith.constant 0 : i32
    %c0_i32_0 = arith.constant 0 : i32
    %c0_i32_1 = arith.constant 0 : i32
    return %c0_i32, %c0_i32_0 : i32, i32
  }
  func.func @transform_7(%arg0: i32) -> (i32, i32) {
    %c0_i32 = arith.constant 0 : i32
    %c0_i32_0 = arith.constant 0 : i32
    %c0_i32_1 = arith.constant 0 : i32
    return %c0_i32, %c0_i32_0 : i32, i32
  }
  func.func @transform_8(%arg0: i32) -> (i32, i32) {
    %c0_i32 = arith.constant 0 : i32
    %c0_i32_0 = arith.constant 0 : i32
    %c0_i32_1 = arith.constant 0 : i32
    return %c0_i32, %c0_i32_0 : i32, i32
  }
  func.func @transform_9(%arg0: i32) -> (i32, i32, i32) {
    %c0_i32 = arith.constant 0 : i32
    %c0_i32_0 = arith.constant 0 : i32
    %c0_i32_1 = arith.constant 0 : i32
    return %arg0, %c0_i32, %c0_i32_0 : i32, i32, i32
  }
}

</mosaic_0001>

<bundles_post_ra>
// kernel: tpu_custom_call.1
= control target key start
LH: loop header
LB: loop body
LE: loop exit
PB: predicated region body
PF: predicated region fallthrough
CT: control target
= control target key end

     0   :  { %14 = vsyncpa [#allocation3], 0  ;;  %s7133_s0 = inlined_call_operand.hbm [shape: f32[2,8,32], index: 0, kind: input, shape index: {}]   ;;  %s7134_s1 = inlined_call_operand.hbm [shape: f32[2,8,32], index: 1, kind: input, shape index: {}]   ;;  %s7135_s2 = inlined_call_operand.vmem [shape: f32[2,8], index: 2, kind: input, shape index: {}]   ;;  %s7136_s3 = inlined_call_operand.hbm [shape: f32[32,32], index: 3, kind: input, shape index: {}]   ;;  %s7137_s4 = inlined_call_operand.vmem [shape: f32[1,32], index: 4, kind: input, shape index: {}]   ;;  %s7138_s5 = inlined_call_operand.hbm [shape: f32[32,64], index: 5, kind: input, shape index: {}]   ;;  %s7139_s6 = inlined_call_operand.vmem [shape: f32[1,64], index: 6, kind: input, shape index: {}]   ;;  %s7140_s7 = inlined_call_operand.hbm [shape: f32[32,32], index: 7, kind: input, shape index: {}]   ;;  %s7141_s8 = inlined_call_operand.vmem [shape: f32[1,32], index: 8, kind: input, shape index: {}]   ;;  %s7142_s9 = inlined_call_operand.hbm [shape: f32[2,8,32], index: 9, kind: output, shape index: {}]  }
   0x1   :  { %15 = vsyncpa [#allocation6], 0 }
   0x2   :  { %16 = vsyncpa [#allocation9], 0 }
   0x3   :  { %17 = vsyncpa [#allocation4], 0  ;;  %s6054_s30 = smov [#allocation5]   ;;  %s6055_s11 = smov [#allocation8]  }
   0x4   :  { %s35_s10 = sshll.u32 %s6054_s30, 4  ;;  %s63_s12 = sshll.u32 %s6055_s11, 4  ;;  %s36_s10 = int_to_ptr.vmem [resolvable:$true] %s35_s10  ;;  %s6131_s12 = int_to_ptr.vmem [resolvable:$true] %s63_s12 }
   0x5   :  { %s5914_s15 = scalar_lea.hbm %s7134_s1, 256 }
   0x6   :  { %p5915_p0 = scmp.ne.s32.totalorder %s7134_s1, %s5914_s15  ;;  %p5918_p1 = scmp.lt.u32.totalorder %s5914_s15, %s7134_s1 }
   0x8   :  { %p5920_p2 = pnand %p5918_p1, %p5915_p0 }
   0xa   :  { %5923 = shalt.err (!%p5920_p2)
}
   0xb   :  { %s5924_s20 = scalar_lea.vmem %s36_s10, 256  ;;  %p5929_p4 = scmp.lt.s32.totalorder %s36_s10, %s36_s10 }
   0xc   :  { %p5925_p3 = scmp.ne.s32.totalorder %s36_s10, %s5924_s20  ;;  %p5930_p5 = scmp.lt.s32.totalorder %s5924_s20, %s5924_s20 }
   0xe   :  { %p5931_p6 = por %p5930_p5, %p5929_p4 }
  0x10   :  { %p5932_p7 = pnand %p5931_p6, %p5925_p3 }
  0x12   :  { %5935 = shalt.err (!%p5932_p7)
}
  0x13   :  { %s6056_s21 = smov 128   ;;  %s6057_s22 = smov 8  }
  0x14   :  { %41 = dma.hbm_to_vmem [thread:$0]  %s7134_s1, 256, %s36_s10, [#allocation6], %s6056_s21, %s6056_s21, %s6057_s22  }
  0x15   :  { %s5936_s27 = scalar_lea.hbm %s7138_s5, 512 }
  0x16   :  { %p5937_p8 = scmp.ne.s32.totalorder %s7138_s5, %s5936_s27  ;;  %p5940_p9 = scmp.lt.u32.totalorder %s5936_s27, %s7138_s5 }
  0x18   :  { %p5942_p10 = pnand %p5940_p9, %p5937_p8 }
  0x1a   :  { %5945 = shalt.err (!%p5942_p10)
}
  0x1b   :  { %s5946_s13 = scalar_lea.vmem %s6131_s12, 512  ;;  %p5951_p12 = scmp.lt.s32.totalorder %s6131_s12, %s6131_s12 }
  0x1c   :  { %p5947_p11 = scmp.ne.s32.totalorder %s6131_s12, %s5946_s13  ;;  %p5952_p13 = scmp.lt.s32.totalorder %s5946_s13, %s5946_s13 }
  0x1e   :  { %p5953_p0 = por %p5952_p13, %p5951_p12 }
  0x20   :  { %p5954_p1 = pnand %p5953_p0, %p5947_p11 }
  0x22   :  { %5957 = shalt.err (!%p5954_p1)
}
  0x23   :  { %69 = dma.hbm_to_vmem [thread:$0]  %s7138_s5, 512, %s6131_s12, [#allocation9], %s6056_s21, %s6056_s21, %s6057_s22  }
  0x24   :  { %s6058_s14 = smov [#allocation2]   ;;  %s6059_s16 = smov [#allocation7]  }
  0x25   :  { %s23_s15 = sshll.u32 %s6058_s14, 4  ;;  %s49_s17 = sshll.u32 %s6059_s16, 4  ;;  %s24_s15 = int_to_ptr.vmem [resolvable:$true] %s23_s15  ;;  %s6168_s17 = int_to_ptr.vmem [resolvable:$true] %s49_s17 }
  0x26   :  { %s5958_s20 = scalar_lea.hbm %s7133_s0, 256 }
  0x27   :  { %p5959_p2 = scmp.ne.s32.totalorder %s7133_s0, %s5958_s20  ;;  %p5962_p3 = scmp.lt.u32.totalorder %s5958_s20, %s7133_s0 }
  0x29   :  { %p5964_p4 = pnand %p5962_p3, %p5959_p2 }
  0x2b   :  { %5967 = shalt.err (!%p5964_p4)
}
  0x2c   :  { %s5968_s5 = scalar_lea.vmem %s24_s15, 256  ;;  %p5973_p6 = scmp.lt.s32.totalorder %s24_s15, %s24_s15 }
  0x2d   :  { %p5969_p5 = scmp.ne.s32.totalorder %s24_s15, %s5968_s5  ;;  %p5974_p7 = scmp.lt.s32.totalorder %s5968_s5, %s5968_s5 }
  0x2f   :  { %p5975_p8 = por %p5974_p7, %p5973_p6 }
  0x31   :  { %p5976_p9 = pnand %p5975_p8, %p5969_p5 }
  0x33   :  { %5979 = shalt.err (!%p5976_p9)
}
  0x34   :  { %29 = dma.hbm_to_vmem [thread:$0]  %s7133_s0, 256, %s24_s15, [#allocation3], %s6056_s21, %s6056_s21, %s6057_s22  }
  0x35   :  { %s5980_s30 = scalar_lea.hbm %s7136_s3, 512 }
  0x36   :  { %p5981_p10 = scmp.ne.s32.totalorder %s7136_s3, %s5980_s30  ;;  %p5984_p11 = scmp.lt.u32.totalorder %s5980_s30, %s7136_s3 }
  0x38   :  { %p5986_p12 = pnand %p5984_p11, %p5981_p10 }
  0x3a   :  { %5989 = shalt.err (!%p5986_p12)
}
  0x3b   :  { %s5990_s14 = scalar_lea.vmem %s6168_s17, 512  ;;  %p5995_p0 = scmp.lt.s32.totalorder %s6168_s17, %s6168_s17 }
  0x3c   :  { %p5991_p13 = scmp.ne.s32.totalorder %s6168_s17, %s5990_s14  ;;  %p5996_p1 = scmp.lt.s32.totalorder %s5990_s14, %s5990_s14 }
  0x3e   :  { %p5997_p2 = por %p5996_p1, %p5995_p0 }
  0x40   :  { %p5998_p3 = pnand %p5997_p2, %p5991_p13 }
  0x42   :  { %6001 = shalt.err (!%p5998_p3)
}
  0x43   :  { %55 = dma.hbm_to_vmem [thread:$0]  %s7136_s3, 512, %s6168_s17, [#allocation6], %s6056_s21, %s6056_s21, %s6057_s22  }
  0x44   :  { %s6060_s16 = smov [#allocation10]   ;;  %s6002_s23 = scalar_lea.hbm %s7140_s7, 512 }
  0x45   :  { %s77_s18 = sshll.u32 %s6060_s16, 4  ;;  %p6003_p4 = scmp.ne.s32.totalorder %s7140_s7, %s6002_s23  ;;  %s78_s18 = int_to_ptr.vmem [resolvable:$true] %s77_s18 }
  0x46   :  { %p6006_p5 = scmp.lt.u32.totalorder %s6002_s23, %s7140_s7 }
  0x48   :  { %p6008_p6 = pnand %p6006_p5, %p6003_p4 }
  0x4a   :  { %6011 = shalt.err (!%p6008_p6)
}
  0x4b   :  { %s6012_s12 = scalar_lea.vmem %s78_s18, 512  ;;  %p6017_p8 = scmp.lt.s32.totalorder %s78_s18, %s78_s18 }
  0x4c   :  { %p6013_p7 = scmp.ne.s32.totalorder %s78_s18, %s6012_s12  ;;  %p6018_p9 = scmp.lt.s32.totalorder %s6012_s12, %s6012_s12 }
  0x4e   :  { %p6019_p10 = por %p6018_p9, %p6017_p8 }
  0x50   :  { %p6020_p11 = pnand %p6019_p10, %p6013_p7 }
  0x52   :  { %6023 = shalt.err (!%p6020_p11)
}
  0x53   :  { %83 = dma.hbm_to_vmem [thread:$0]  %s7140_s7, 512, %s78_s18, [#allocation9], %s6056_s21, %s6056_s21, %s6057_s22  }
  0x54   :  { %6046 = dma.done.wait [#allocation3], 256  }
  0x55   :  { %6047 = vsyncadd [#allocation3], 4294967040 }
  0x56   :  { %6048 = dma.done.wait [#allocation6], 768  }
  0x57   :  { %6049 = vsyncadd [#allocation6], 4294966528 }
  0x58   :  { %6050 = dma.done.wait [#allocation9], 1024  }
  0x59   :  { %6051 = vsyncadd [#allocation9], 4294966272  ;;  %v198_v0 = vld [vmem:[#allocation8] sm:$0xff]  ;;  %v199_v1 = vld [vmem:[#allocation8 + $0x8] sm:$0xff]  ;;  %vm116_vm0 = vcmask 261120   ;;  %s6061_s30 = smov 120   ;;  %v339_v29 = vlaneseq }
  0x5a   :  { %v105_v2 = vld [vmem:[#allocation7] sm:$0xff]  ;;  %v5807_v3 = vpack.c.bf16 %v199_v1, %v198_v0  ;;  %v106_v4 = vld [vmem:[#allocation7 + $0x8] sm:$0xff]  ;;  %v200_v5 = vld [vmem:[#allocation8 + $0x10] sm:$0xff]  ;;  %s6062_s11 = smov 124   ;;  %s6063_s13 = smov 116   ;;  %v6066_v26 = vmov 0.0  }
  0x5b   :  { %v201_v6 = vld [vmem:[#allocation8 + $0x18] sm:$0xff]  ;;  %v5799_v7 = vpack.c.bf16 %v106_v4, %v105_v2  ;;  %v107_v9 = vld [vmem:[#allocation7 + $0x10] sm:$0xff]  ;;  %v101_v13 = vld [vmem:[#allocation2] sm:$0xff]  ;;  %s6067_s1 = smov 104   ;;  %s6068_s10 = smov 100   ;;  %vm6069_vm1 = vmmov 0  }
  0x5c   :  { %v5811_v8 = vpack.c.bf16 %v201_v6, %v200_v5  ;;  %v108_v10 = vld [vmem:[#allocation7 + $0x18] sm:$0xff]  ;;  %v103_v11 = vld [vmem:[#allocation5] sm:$0xff]  ;;  %5808 = vmatprep.subr.bf16.mxu1 %v5807_v3  ;;  %5614 = vmatprep.mubr.msk.f32.mxu0 %vm116_vm0, %v101_v13  ;;  %v102_v15 = vld [vmem:[#allocation2 + $0x8] sm:$0xff]  ;;  %s6070_s14 = smov 96   ;;  %v6071_v27 = vmov 1983009808  }
  0x5d   :  { %v5803_v12 = vpack.c.bf16 %v108_v10, %v107_v9  ;;  %5625 = vmatprep.mubr.msk.f32.mxu1 %vm116_vm0, %v103_v11  ;;  %5810 = vmatpush3.bf16.msra.mxu1 %v5807_v3  ;;  %v104_v14 = vld [vmem:[#allocation5 + $0x8] sm:$0xff]  ;;  %v5405_v16 = vld [vmem:[%s7139_s6] ss:$0 sm:$0xff]  ;;  %s6065_s6 = smov 108   ;;  %v337_v28 = vunpack.c.l.s4 %v6071_v27  ;;  %v6072_v30 = vmov 1934713408  }
  0x5e   :  { %5800 = vmatprep.subr.bf16.mxu0 %v5799_v7  ;;  %5812 = vmatprep.subr.bf16.mxu1 %v5811_v8  ;;  %v5402_v18 = vld [vmem:[%s7137_s4] ss:$0 sm:$0xff]  ;;  %s6064_s4 = smov 112   ;;  %v401_v31 = vunpack.c.l.s4 %v6072_v30  ;;  %v6276_v33 = vshrl.u32 %v339_v29, 7  ;;  %vm2058_vm2 = vcmask 31744   ;;  %vm3325_vm3 = vcmask 64512  }
  0x5f   :  { %5802 = vmatpush3.bf16.msra.mxu0 %v5799_v7  ;;  %v338_v32 = vunpack.c.0.s8 %v337_v28  ;;  %s6075_s16 = smov 4   ;;  %s6076_s18 = smov 16   ;;  %vm5274_vm4 = vcmask 97280   ;;  %vm5277_vm5 = vcmask 130048   ;;  %vm5280_vm6 = vcmask 162816  }
  0x60   :  { %5804 = vmatprep.subr.bf16.mxu0 %v5803_v12  ;;  %v402_v36 = vunpack.c.0.s8 %v401_v31  ;;  %s6077_s19 = smov 20   ;;  %s6078_s20 = smov 24   ;;  %vm5283_vm7 = vcmask 195584   ;;  %vm5286_vm8 = vcmask 228352  }
  0x61   :  { %5814 = vmatpush3.bf16.msra.mxu1 %v5811_v8  ;;  %v6281_v37 = vsub.s32 %v338_v32, %v6276_v33  ;;  %s6079_s23 = smov 28   ;;  %s6080_s26 = smov [#allocation11]  }
  0x62   :  { %5628 = vmatprep.subr.mxu1 %v6066_v26  ;;  %v6287_v44 = vsub.s32 %v402_v36, %v6276_v33  ;;  %s5388_s5 = sshll.u32 %s6080_s26, 4  ;;  %s5389_s5 = int_to_ptr.vmem [resolvable:$true] %s5388_s5 }
  0x63   :  { %5806 = vmatpush3.bf16.msra.mxu0 %v5803_v12  ;;  %s6024_s12 = scalar_lea.vmem %s5389_s5, 256  ;;  %p6029_p13 = scmp.lt.s32.totalorder %s5389_s5, %s5389_s5 }
  0x64   :  { %5626 = vmatmul.mubr.msk.f32.vlgmr.msra.gmra.mrb[0].mxu1 %vm116_vm0, %v104_v14  ;;  %5638 = vmatprep.subr.mxu0 %v6066_v26  ;;  %p6025_p12 = scmp.ne.s32.totalorder %s5389_s5, %s6024_s12  ;;  %p6030_p0 = scmp.lt.s32.totalorder %s6024_s12, %s6024_s12 }
  0x65   :  { %5630 = vmatprep.mubr.msk.f32.mxu1 %vm6069_vm1, %v6066_v26 }
  0x66   :  { %5615 = vmatmul.mubr.msk.f32.vlgmr.msra.gmra.mrb[0].mxu0 %vm116_vm0, %v102_v15  ;;  %p6031_p1 = por %p6030_p0, %p6029_p13 }
  0x67   :  { %5640 = vmatprep.mubr.msk.f32.mxu0 %vm6069_vm1, %v6066_v26 }
  0x68   :  { %p6032_p2 = pnand %p6031_p1, %p6025_p12 }
 0x137   :  { %v5627_v17 = vpop.f32.mrb[0].mxu1 }
 0x138   :  { %v6230_v19 = vadd.f32 %v5627_v17, %v5405_v16  ;;  %v281_v20 = vpop.f32.mrb[1].mxu1 }
 0x139   :  { %v5616_v21 = vpop.f32.mrb[0].mxu0  ;;  %v6240_v24 = vadd.f32 %v5405_v16, %v281_v20 }
 0x13a   :  { %v189_v22 = vpop.f32.mrb[1].mxu0  ;;  %888 = vrot.lane.b32.xlu1 %v6230_v19, %s6061_s30  ;;  %882 = vrot.lane.b32.xlu0 %v6230_v19, %s6062_s11  ;;  %v6234_v23 = vadd.f32 %v5616_v21, %v5402_v18 }
 0x13b   :  { %v6244_v25 = vadd.f32 %v5402_v18, %v189_v22 }
 0x13e   :  { %894 = vrot.lane.b32.xlu0 %v6230_v19, %s6063_s13  ;;  %294 = vrot.lane.b32.xlu1 %v6234_v23, %s6062_s11 }
 0x142   :  { %300 = vrot.lane.b32.xlu0 %v6234_v23, %s6061_s30  ;;  %306 = vrot.lane.b32.xlu1 %v6234_v23, %s6063_s13 }
 0x146   :  { %880 = vrot.lane.b32.xlu0 %v6240_v24, %s6062_s11  ;;  %892 = vrot.lane.b32.xlu1 %v6240_v24, %s6063_s13 }
 0x14a   :  { %886 = vrot.lane.b32.xlu0 %v6240_v24, %s6061_s30  ;;  %292 = vrot.lane.b32.xlu1 %v6244_v25, %s6062_s11 }
 0x14e   :  { %298 = vrot.lane.b32.xlu0 %v6244_v25, %s6061_s30  ;;  %304 = vrot.lane.b32.xlu1 %v6244_v25, %s6063_s13 }
 0x152   :  { %898 = vrot.lane.b32.xlu0 %v6240_v24, %s6064_s4  ;;  %904 = vrot.lane.b32.xlu1 %v6240_v24, %s6065_s6 }
 0x156   :  { %910 = vrot.lane.b32.xlu0 %v6240_v24, %s6067_s1  ;;  %916 = vrot.lane.b32.xlu1 %v6240_v24, %s6068_s10 }
 0x15a   :  { %310 = vrot.lane.b32.xlu0 %v6244_v25, %s6064_s4  ;;  %316 = vrot.lane.b32.xlu1 %v6244_v25, %s6065_s6 }
 0x15e   :  { %322 = vrot.lane.b32.xlu0 %v6244_v25, %s6067_s1  ;;  %328 = vrot.lane.b32.xlu1 %v6244_v25, %s6068_s10 }
 0x162   :  { %900 = vrot.lane.b32.xlu0 %v6230_v19, %s6064_s4  ;;  %906 = vrot.lane.b32.xlu1 %v6230_v19, %s6065_s6 }
 0x166   :  { %912 = vrot.lane.b32.xlu0 %v6230_v19, %s6067_s1  ;;  %918 = vrot.lane.b32.xlu1 %v6230_v19, %s6068_s10 }
 0x16a   :  { %312 = vrot.lane.b32.xlu0 %v6234_v23, %s6064_s4  ;;  %318 = vrot.lane.b32.xlu1 %v6234_v23, %s6065_s6 }
 0x16e   :  { %324 = vrot.lane.b32.xlu0 %v6234_v23, %s6067_s1  ;;  %330 = vrot.lane.b32.xlu1 %v6234_v23, %s6068_s10 }
 0x172   :  { %1468 = vrot.lane.b32.xlu1 %v6230_v19, %s6070_s14 }
 0x176   :  { %1466 = vrot.lane.b32.xlu1 %v6240_v24, %s6070_s14 }
 0x1ac   :  { %v889_v34 = vpop.permute.xlu1 %888  ;;  %v883_v35 = vpop.permute.xlu0 %882 }
 0x1ad   :  { %1472 = vrot.lane.b32.xlu0 %v883_v35, %s6070_s14  ;;  %1476 = vrot.lane.b32.xlu1 %v889_v34, %s6070_s14  ;;  %v1058_v38 = vcombine.low %v6230_v19, %v889_v34  ;;  %v1059_v39 = vcombine.high %v6230_v19, %v889_v34 }
 0x1af   :  { %v1066_v45 = vrot.slane %v1058_v38, %v6281_v37  ;;  %v1073_v46 = vrot.slane %v1059_v39, %v6281_v37 }
 0x1b0   :  { %v895_v40 = vpop.permute.xlu0 %894  ;;  %v295_v41 = vpop.permute.xlu1 %294 }
 0x1b1   :  { %v1074_v42 = vcombine.low %v883_v35, %v895_v40  ;;  %v1075_v43 = vcombine.high %v883_v35, %v895_v40  ;;  %1480 = vrot.lane.b32.xlu1 %v895_v40, %s6070_s14 }
 0x1b3   :  { %v1082_v47 = vrot.slane %v1074_v42, %v6281_v37  ;;  %v1089_v48 = vrot.slane %v1075_v43, %v6281_v37 }
 0x1b4   :  { %v301_v49 = vpop.permute.xlu0 %300  ;;  %v307_v50 = vpop.permute.xlu1 %306 }
 0x1b5   :  { %v1122_v51 = vcombine.low %v1066_v45, %v1082_v47  ;;  %v1123_v52 = vcombine.high %v1066_v45, %v1082_v47  ;;  %v1138_v53 = vcombine.low %v1073_v46, %v1089_v48  ;;  %v1139_v54 = vcombine.high %v1073_v46, %v1089_v48 }
 0x1b6   :  { %v470_v55 = vcombine.low %v6234_v23, %v301_v49  ;;  %v471_v56 = vcombine.high %v6234_v23, %v301_v49  ;;  %v486_v57 = vcombine.low %v295_v41, %v307_v50  ;;  %v487_v58 = vcombine.high %v295_v41, %v307_v50 }
 0x1b7   :  { %v1130_v59 = vrot.slane %v1122_v51, %v6287_v44  ;;  %v1137_v60 = vrot.slane %v1123_v52, %v6287_v44  ;;  %v1146_v61 = vrot.slane %v1138_v53, %v6287_v44  ;;  %v1153_v62 = vrot.slane %v1139_v54, %v6287_v44 }
 0x1b8   :  { %v478_v63 = vrot.slane %v470_v55, %v6281_v37  ;;  %v485_v0 = vrot.slane %v471_v56, %v6281_v37  ;;  %v494_v1 = vrot.slane %v486_v57, %v6281_v37  ;;  %v501_v2 = vrot.slane %v487_v58, %v6281_v37  ;;  %v6303_v3 = vpop.permute.xlu0 %880  ;;  %v6305_v4 = vpop.permute.xlu1 %892 }
 0x1b9   :  { %v5432_v5 = vcombine.low %v1130_v59, %v1137_v60  ;;  %v5434_v6 = vcombine.high %v1130_v59, %v1137_v60  ;;  %v5436_v7 = vcombine.low %v1146_v61, %v1153_v62  ;;  %v5438_v8 = vcombine.high %v1146_v61, %v1153_v62 }
 0x1ba   :  { %v534_v9 = vcombine.low %v478_v63, %v494_v1  ;;  %v535_v10 = vcombine.high %v478_v63, %v494_v1  ;;  %v550_v11 = vcombine.low %v485_v0, %v501_v2  ;;  %v551_v12 = vcombine.high %v485_v0, %v501_v2 }
 0x1bb   :  { %v6308_v13 = vrot.slane %v5432_v5, %v6281_v37  ;;  %v6311_v14 = vrot.slane %v5434_v6, %v6281_v37  ;;  %v6314_v15 = vrot.slane %v5436_v7, %v6281_v37  ;;  %v6317_v16 = vrot.slane %v5438_v8, %v6281_v37 }
 0x1bc   :  { %v542_v17 = vrot.slane %v534_v9, %v6287_v44  ;;  %v549_v18 = vrot.slane %v535_v10, %v6287_v44  ;;  %v558_v19 = vrot.slane %v550_v11, %v6287_v44  ;;  %v565_v20 = vrot.slane %v551_v12, %v6287_v44  ;;  %v6323_v21 = vpop.permute.xlu0 %886  ;;  %v293_v22 = vpop.permute.xlu1 %292 }
 0x1bd   :  { %v938_v30 = vcombine.low %v6303_v3, %v6305_v4  ;;  %v939_v31 = vcombine.high %v6303_v3, %v6305_v4  ;;  %v922_v32 = vcombine.low %v6240_v24, %v6323_v21  ;;  %v923_v34 = vcombine.high %v6240_v24, %v6323_v21 }
 0x1be   :  { %v5416_v23 = vcombine.low %v542_v17, %v549_v18  ;;  %v5418_v27 = vcombine.high %v542_v17, %v549_v18  ;;  %v5420_v28 = vcombine.low %v558_v19, %v565_v20  ;;  %v5422_v29 = vcombine.high %v558_v19, %v565_v20 }
 0x1bf   :  { %v1394_v35 = vcombine.low %v6308_v13, %v6311_v14  ;;  %v1395_v36 = vcombine.high %v6308_v13, %v6311_v14  ;;  %v1426_v38 = vcombine.low %v6314_v15, %v6317_v16  ;;  %v1427_v39 = vcombine.high %v6314_v15, %v6317_v16 }
 0x1c0   :  { %v299_v40 = vpop.permute.xlu0 %298  ;;  %v305_v41 = vpop.permute.xlu1 %304  ;;  %v946_v42 = vrot.slane %v938_v30, %v6281_v37  ;;  %v953_v43 = vrot.slane %v939_v31, %v6281_v37  ;;  %v930_v24 = vrot.slane %v922_v32, %v6281_v37  ;;  %v937_v45 = vrot.slane %v923_v34, %v6281_v37 }
 0x1c1   :  { %v6346_v46 = vrot.slane %v5416_v23, %v6281_v37  ;;  %v6349_v47 = vrot.slane %v5418_v27, %v6281_v37  ;;  %v6352_v48 = vrot.slane %v5420_v28, %v6281_v37  ;;  %v6355_v49 = vrot.slane %v5422_v29, %v6281_v37 }
 0x1c2   :  { %v986_v50 = vcombine.low %v930_v24, %v946_v42  ;;  %v987_v51 = vcombine.high %v930_v24, %v946_v42  ;;  %v1002_v52 = vcombine.low %v937_v45, %v953_v43  ;;  %v1003_v53 = vcombine.high %v937_v45, %v953_v43 }
 0x1c3   :  { %v334_v54 = vcombine.low %v6244_v25, %v299_v40  ;;  %v335_v55 = vcombine.high %v6244_v25, %v299_v40  ;;  %v350_v56 = vcombine.low %v293_v22, %v305_v41  ;;  %v351_v57 = vcombine.high %v293_v22, %v305_v41 }
 0x1c4   :  { %v6359_v58 = vpop.permute.xlu0 %898  ;;  %v6361_v59 = vpop.permute.xlu1 %904  ;;  %v994_v60 = vrot.slane %v986_v50, %v6287_v44  ;;  %v1001_v61 = vrot.slane %v987_v51, %v6287_v44  ;;  %v1010_v62 = vrot.slane %v1002_v52, %v6287_v44  ;;  %v1017_v63 = vrot.slane %v1003_v53, %v6287_v44 }
 0x1c5   :  { %v342_v0 = vrot.slane %v334_v54, %v6281_v37  ;;  %v349_v1 = vrot.slane %v335_v55, %v6281_v37  ;;  %v358_v25 = vrot.slane %v350_v56, %v6281_v37  ;;  %v365_v2 = vrot.slane %v351_v57, %v6281_v37 }
 0x1c6   :  { %v5424_v5 = vcombine.low %v994_v60, %v1001_v61  ;;  %v5426_v6 = vcombine.high %v994_v60, %v1001_v61  ;;  %v5428_v7 = vcombine.low %v1010_v62, %v1017_v63  ;;  %v5430_v8 = vcombine.high %v1010_v62, %v1017_v63 }
 0x1c7   :  { %v398_v9 = vcombine.low %v342_v0, %v358_v25  ;;  %v399_v10 = vcombine.high %v342_v0, %v358_v25  ;;  %v414_v11 = vcombine.low %v349_v1, %v365_v2  ;;  %v415_v12 = vcombine.high %v349_v1, %v365_v2 }
 0x1c8   :  { %v6371_v17 = vpop.permute.xlu0 %910  ;;  %v6373_v18 = vpop.permute.xlu1 %916  ;;  %v1202_v19 = vrot.slane %v5424_v5, %v6281_v37  ;;  %v1218_v20 = vrot.slane %v5426_v6, %v6281_v37  ;;  %v1234_v22 = vrot.slane %v5428_v7, %v6281_v37  ;;  %v1250_v23 = vrot.slane %v5430_v8, %v6281_v37 }
 0x1c9   :  { %v406_v27 = vrot.slane %v398_v9, %v6287_v44  ;;  %v413_v28 = vrot.slane %v399_v10, %v6287_v44  ;;  %v422_v29 = vrot.slane %v414_v11, %v6287_v44  ;;  %v429_v30 = vrot.slane %v415_v12, %v6287_v44 }
 0x1ca   :  { %v1258_v31 = vcombine.low %v1202_v19, %v1218_v20  ;;  %v1259_v32 = vcombine.high %v1202_v19, %v1218_v20  ;;  %v1290_v34 = vcombine.low %v1234_v22, %v1250_v23  ;;  %v1291_v40 = vcombine.high %v1234_v22, %v1250_v23 }
 0x1cb   :  { %v5408_v41 = vcombine.low %v406_v27, %v413_v28  ;;  %v5410_v42 = vcombine.high %v406_v27, %v413_v28  ;;  %v5412_v43 = vcombine.low %v422_v29, %v429_v30  ;;  %v5414_v24 = vcombine.high %v422_v29, %v429_v30 }
 0x1cc   :  { %v311_v45 = vpop.permute.xlu0 %310  ;;  %v6383_v50 = vpop.permute.xlu1 %316  ;;  %v954_v51 = vcombine.low %v6359_v58, %v6371_v17  ;;  %v955_v52 = vcombine.high %v6359_v58, %v6371_v17  ;;  %v970_v53 = vcombine.low %v6361_v59, %v6373_v18  ;;  %v971_v54 = vcombine.high %v6361_v59, %v6373_v18 }
 0x1cd   :  { %v6394_v55 = vrot.slane %v5408_v41, %v6281_v37  ;;  %v6397_v56 = vrot.slane %v5410_v42, %v6281_v37  ;;  %v6400_v57 = vrot.slane %v5412_v43, %v6281_v37  ;;  %v6403_v60 = vrot.slane %v5414_v24, %v6281_v37 }
 0x1ce   :  { %v962_v61 = vrot.slane %v954_v51, %v6281_v37  ;;  %v969_v62 = vrot.slane %v955_v52, %v6281_v37  ;;  %v978_v63 = vrot.slane %v970_v53, %v6281_v37  ;;  %v985_v0 = vrot.slane %v971_v54, %v6281_v37 }
 0x1cf   :  { %v806_v1 = vcombine.low %v6346_v46, %v6349_v47  ;;  %v807_v25 = vcombine.high %v6346_v46, %v6349_v47  ;;  %v670_v2 = vcombine.low %v6394_v55, %v6397_v56  ;;  %v702_v5 = vcombine.low %v6400_v57, %v6403_v60 }
 0x1d0   :  { %v323_v6 = vpop.permute.xlu0 %322  ;;  %v329_v7 = vpop.permute.xlu1 %328  ;;  %v1018_v8 = vcombine.low %v962_v61, %v978_v63  ;;  %v1019_v9 = vcombine.high %v962_v61, %v978_v63  ;;  %v1034_v10 = vcombine.low %v969_v62, %v985_v0  ;;  %v1035_v11 = vcombine.high %v969_v62, %v985_v0 }
 0x1d1   :  { %v1266_v12 = vrot.slane %v1258_v31, %v6287_v44  ;;  %v1298_v19 = vrot.slane %v1290_v34, %v6287_v44  ;;  %v6420_v20 = vrot.slane %v1259_v32, %v6287_v44  ;;  %v6423_v22 = vrot.slane %v1291_v40, %v6287_v44 }
 0x1d2   :  { %v1026_v23 = vrot.slane %v1018_v8, %v6287_v44  ;;  %v1033_v27 = vrot.slane %v1019_v9, %v6287_v44  ;;  %v1042_v28 = vrot.slane %v1034_v10, %v6287_v44  ;;  %v1049_v29 = vrot.slane %v1035_v11, %v6287_v44 }
 0x1d3   :  { %v1322_v30 = vcombine.low %v1266_v12, %v1298_v19  ;;  %v1324_v31 = vcombine.low %v6420_v20, %v6423_v22  ;;  %v366_v41 = vcombine.low %v311_v45, %v323_v6  ;;  %v367_v34 = vcombine.high %v311_v45, %v323_v6 }
 0x1d4   :  { %v6431_v42 = vpop.permute.xlu0 %900  ;;  %v6433_v32 = vpop.permute.xlu1 %906  ;;  %v5425_v40 = vcombine.low %v1026_v23, %v1033_v27  ;;  %v5427_v43 = vcombine.high %v1026_v23, %v1033_v27  ;;  %v5429_v24 = vcombine.low %v1042_v28, %v1049_v29  ;;  %v5431_v51 = vcombine.high %v1042_v28, %v1049_v29 }
 0x1d5   :  { %1484 = vrot.lane.b32.xlu0 %v6431_v42, %s6070_s14  ;;  %v671_v52 = vcombine.high %v6394_v55, %v6397_v56  ;;  %5629 = vmatpush3.xpose.msk.msra.mxu1 %vm2058_vm2, %v1322_v30  ;;  %v374_v45 = vrot.slane %v366_v41, %v6281_v37  ;;  %v382_v53 = vcombine.low %v6383_v50, %v329_v7 }
 0x1d6   :  { %5639 = vmatpush3.xpose.msk.msra.mxu0 %vm2058_vm2, %v1324_v31  ;;  %v703_v54 = vcombine.high %v6400_v57, %v6403_v60  ;;  %v6446_v61 = vrot.slane %v5425_v40, %v6281_v37  ;;  %v6449_v62 = vrot.slane %v5427_v43, %v6281_v37  ;;  %v381_v63 = vrot.slane %v367_v34, %v6281_v37 }
 0x1d7   :  { %5633 = vmatprep.subr.mxu1 %v6066_v26  ;;  %v383_v55 = vcombine.high %v6383_v50, %v329_v7  ;;  %v390_v56 = vrot.slane %v382_v53, %v6281_v37  ;;  %v678_v0 = vrot.slane %v670_v2, %v6287_v44  ;;  %v710_v6 = vrot.slane %v702_v5, %v6287_v44 }
 0x1d8   :  { %1488 = vrot.lane.b32.xlu1 %v6433_v32, %s6070_s14  ;;  %v6459_v57 = vpop.permute.xlu0 %912  ;;  %v6461_v60 = vpop.permute.xlu1 %918  ;;  %v838_v8 = vcombine.low %v6352_v48, %v6355_v49  ;;  %v6466_v9 = vrot.slane %v5429_v24, %v6281_v37  ;;  %v6469_v50 = vrot.slane %v5431_v51, %v6281_v37  ;;  %v1274_v2 = vcombine.low %v6446_v61, %v6449_v62 }
 0x1d9   :  { %1470 = vrot.lane.b32.xlu0 %v6303_v3, %s6070_s14  ;;  %v397_v5 = vrot.slane %v383_v55, %v6281_v37  ;;  %v430_v7 = vcombine.low %v374_v45, %v390_v56  ;;  %v431_v10 = vcombine.high %v374_v45, %v390_v56  ;;  %v734_v11 = vcombine.low %v678_v0, %v710_v6 }
 0x1da   :  { %5648 = vmatprep.subr.mxu0 %v6066_v26  ;;  %v1323_v23 = vcombine.high %v1266_v12, %v1298_v19  ;;  %v685_v27 = vrot.slane %v671_v52, %v6287_v44  ;;  %v717_v28 = vrot.slane %v703_v54, %v6287_v44  ;;  %v735_v29 = vcombine.high %v678_v0, %v710_v6 }
 0x1db   :  { %v438_v30 = vrot.slane %v430_v7, %v6287_v44  ;;  %v445_v31 = vrot.slane %v431_v10, %v6287_v44  ;;  %v446_v41 = vcombine.low %v381_v63, %v397_v5  ;;  %v447_v34 = vcombine.high %v381_v63, %v397_v5  ;;  %5631 = vmatmul.mubr.msk.f32.vlgmr.msra.gmra.mrb[2].mxu1 %vm2058_vm2, %v734_v11 }
 0x1dc   :  { %5634 = vmatpush3.xpose.msk.msra.mxu1 %vm2058_vm2, %v1323_v23  ;;  %v736_v3 = vcombine.low %v685_v27, %v717_v28  ;;  %5635 = vmatprep.mubr.msk.f32.mxu1 %vm6069_vm1, %v6066_v26  ;;  %v1325_v12 = vcombine.high %v6420_v20, %v6423_v22  ;;  %v1090_v19 = vcombine.low %v6431_v42, %v6459_v57  ;;  %v6489_v40 = vpop.permute.xlu0 %312  ;;  %v6491_v43 = vpop.permute.xlu1 %318 }
 0x1dd   :  { %v454_v24 = vrot.slane %v446_v41, %v6287_v44  ;;  %v461_v51 = vrot.slane %v447_v34, %v6287_v44  ;;  %v5409_v52 = vcombine.low %v438_v30, %v445_v31  ;;  %v5411_v45 = vcombine.high %v438_v30, %v445_v31  ;;  %5643 = vmatprep.subr.mxu1 %v6066_v26 }
 0x1de   :  { %5641 = vmatmul.mubr.msk.f32.vlgmr.msra.gmra.mrb[2].mxu0 %vm2058_vm2, %v736_v3  ;;  %v1091_v20 = vcombine.high %v6431_v42, %v6459_v57  ;;  %v1098_v22 = vrot.slane %v1090_v19, %v6281_v37  ;;  %v1106_v53 = vcombine.low %v6433_v32, %v6461_v60  ;;  %v1107_v54 = vcombine.high %v6433_v32, %v6461_v60 }
 0x1df   :  { %v6505_v63 = vrot.slane %v5409_v52, %v6281_v37  ;;  %v6508_v55 = vrot.slane %v5411_v45, %v6281_v37  ;;  %v5413_v56 = vcombine.low %v454_v24, %v461_v51  ;;  %v5415_v0 = vcombine.high %v454_v24, %v461_v51  ;;  %5636 = vmatmul.mubr.msk.f32.vlgmr.msra.gmra.mrb[4].mxu1 %vm2058_vm2, %v735_v29 }
 0x1e0   :  { %5644 = vmatpush3.xpose.msk.msra.mxu1 %vm2058_vm2, %v1325_v12  ;;  %v1105_v42 = vrot.slane %v1091_v20, %v6281_v37  ;;  %v1114_v6 = vrot.slane %v1106_v53, %v6281_v37  ;;  %v1121_v5 = vrot.slane %v1107_v54, %v6281_v37  ;;  %1474 = vrot.lane.b32.xlu1 %v6323_v21, %s6070_s14  ;;  %v325_v21 = vpop.permute.xlu0 %324  ;;  %v331_v41 = vpop.permute.xlu1 %330 }
 0x1e1   :  { %v839_v32 = vcombine.high %v6352_v48, %v6355_v49  ;;  %v1275_v7 = vcombine.high %v6446_v61, %v6449_v62  ;;  %v1306_v10 = vcombine.low %v6466_v9, %v6469_v50  ;;  %v6524_v11 = vrot.slane %v5413_v56, %v6281_v37  ;;  %5645 = vmatprep.mubr.msk.f32.mxu1 %vm6069_vm1, %v6066_v26 }
 0x1e2   :  { %v1154_v23 = vcombine.low %v1098_v22, %v1114_v6  ;;  %v1155_v29 = vcombine.high %v1098_v22, %v1114_v6  ;;  %v1170_v30 = vcombine.low %v1105_v42, %v1121_v5  ;;  %v1171_v31 = vcombine.high %v1105_v42, %v1121_v5  ;;  %5653 = vmatprep.subr.mxu1 %v6066_v26 }
 0x1e3   :  { %v669_v34 = vrot.slane %v5415_v0, %v6281_v37  ;;  %v686_v61 = vcombine.low %v6505_v63, %v6508_v55  ;;  %v737_v62 = vcombine.high %v685_v27, %v717_v28  ;;  %v1282_v3 = vrot.slane %v1274_v2, %v6287_v44  ;;  %1486 = vrot.lane.b32.xlu0 %v6361_v59, %s6070_s14 }
 0x1e4   :  { %v1162_v12 = vrot.slane %v1154_v23, %v6287_v44  ;;  %v1169_v19 = vrot.slane %v1155_v29, %v6287_v44  ;;  %v1178_v24 = vrot.slane %v1170_v30, %v6287_v44  ;;  %v1185_v51 = vrot.slane %v1171_v31, %v6287_v44  ;;  %1478 = vrot.lane.b32.xlu1 %v6305_v4, %s6070_s14 }
 0x1e5   :  { %5646 = vmatmul.mubr.msk.f32.vlgmr.msra.gmra.mrb[6].mxu1 %vm2058_vm2, %v737_v62  ;;  %v1314_v27 = vrot.slane %v1306_v10, %v6287_v44  ;;  %v502_v2 = vcombine.low %v6489_v40, %v325_v21  ;;  %v503_v28 = vcombine.high %v6489_v40, %v325_v21  ;;  %v518_v59 = vcombine.low %v6491_v43, %v331_v41 }
 0x1e6   :  { %v5433_v52 = vcombine.low %v1162_v12, %v1169_v19  ;;  %v5435_v45 = vcombine.high %v1162_v12, %v1169_v19  ;;  %v5437_v20 = vcombine.low %v1178_v24, %v1185_v51  ;;  %v5439_v22 = vcombine.high %v1178_v24, %v1185_v51  ;;  %5650 = vmatprep.mubr.msk.f32.mxu0 %vm6069_vm1, %v6066_v26 }
 0x1e7   :  { %v718_v53 = vcombine.low %v6524_v11, %v669_v34  ;;  %v1326_v4 = vcombine.low %v1282_v3, %v1314_v27  ;;  %v1327_v54 = vcombine.high %v1282_v3, %v1314_v27  ;;  %v510_v56 = vrot.slane %v502_v2, %v6281_v37  ;;  %5655 = vmatprep.mubr.msk.f32.mxu1 %vm6069_vm1, %v6066_v26 }
 0x1e8   :  { %v1307_v40 = vcombine.high %v6466_v9, %v6469_v50  ;;  %v687_v0 = vcombine.high %v6505_v63, %v6508_v55  ;;  %v6557_v42 = vrot.slane %v5433_v52, %v6281_v37  ;;  %v6560_v6 = vrot.slane %v5435_v45, %v6281_v37  ;;  %1482 = vrot.lane.b32.xlu1 %v6359_v58, %s6070_s14 }
 0x1e9   :  { %5649 = vmatpush3.xpose.msk.msra.mxu0 %vm2058_vm2, %v1326_v4  ;;  %5654 = vmatpush3.xpose.msk.msra.mxu1 %vm2058_vm2, %v1327_v54  ;;  %v517_v5 = vrot.slane %v503_v28, %v6281_v37  ;;  %v519_v9 = vcombine.high %v6491_v43, %v331_v41  ;;  %v526_v50 = vrot.slane %v518_v59, %v6281_v37 }
 0x1ea   :  { %v719_v63 = vcombine.high %v6524_v11, %v669_v34  ;;  %v6571_v55 = vrot.slane %v5437_v20, %v6281_v37  ;;  %v6574_v10 = vrot.slane %v5439_v22, %v6281_v37  ;;  %5658 = vmatprep.subr.mxu0 %v6066_v26  ;;  %v694_v58 = vrot.slane %v686_v61, %v6287_v44 }
 0x1eb   :  { %v533_v23 = vrot.slane %v519_v9, %v6281_v37  ;;  %v566_v29 = vcombine.low %v510_v56, %v526_v50  ;;  %v567_v30 = vcombine.high %v510_v56, %v526_v50  ;;  %5663 = vmatprep.subr.mxu1 %v6066_v26  ;;  %v726_v43 = vrot.slane %v718_v53, %v6287_v44 }
 0x1ec   :  { %v1410_v11 = vcombine.low %v6557_v42, %v6560_v6  ;;  %v1289_v31 = vrot.slane %v1275_v7, %v6287_v44  ;;  %v1321_v21 = vrot.slane %v1307_v40, %v6287_v44  ;;  %1490 = vrot.lane.b32.xlu1 %v6371_v17, %s6070_s14  ;;  %v701_v41 = vrot.slane %v687_v0, %v6287_v44 }
 0x1ed   :  { %v574_v34 = vrot.slane %v566_v29, %v6287_v44  ;;  %v581_v61 = vrot.slane %v567_v30, %v6287_v44  ;;  %v582_v62 = vcombine.low %v517_v5, %v533_v23  ;;  %v583_v3 = vcombine.high %v517_v5, %v533_v23 }
 0x1ee   :  { %v738_v12 = vcombine.low %v694_v58, %v726_v43  ;;  %v739_v19 = vcombine.high %v694_v58, %v726_v43  ;;  %v1328_v24 = vcombine.low %v1289_v31, %v1321_v21  ;;  %v733_v51 = vrot.slane %v719_v63, %v6287_v44 }
 0x1ef   :  { %v590_v7 = vrot.slane %v582_v62, %v6287_v44  ;;  %v597_v27 = vrot.slane %v583_v3, %v6287_v44  ;;  %v5417_v2 = vcombine.low %v574_v34, %v581_v61  ;;  %v5419_v28 = vcombine.high %v574_v34, %v581_v61  ;;  %v1469_v62 = vpop.permute.xlu1 %1468 }
 0x1f0   :  { %v1411_v17 = vcombine.high %v6557_v42, %v6560_v6  ;;  %5651 = vmatmul.mubr.msk.f32.vlgmr.msra.gmra.mrb[4].mxu0 %vm2058_vm2, %v738_v12  ;;  %5656 = vmatmul.mubr.msk.f32.vlgmr.msra.gmra.mrb[8].mxu1 %vm2058_vm2, %v739_v19  ;;  %v1329_v59 = vcombine.high %v1289_v31, %v1321_v21  ;;  %v1402_v52 = vrot.slane %v1394_v35, %v6287_v44 }
 0x1f1   :  { %v6602_v45 = vrot.slane %v5417_v2, %v6281_v37  ;;  %v6605_v20 = vrot.slane %v5419_v28, %v6281_v37  ;;  %v5421_v22 = vcombine.low %v590_v7, %v597_v27  ;;  %v5423_v53 = vcombine.high %v590_v7, %v597_v27  ;;  %5659 = vmatpush3.xpose.msk.msra.mxu0 %vm2058_vm2, %v1328_v24 }
 0x1f2   :  { %5664 = vmatpush3.xpose.msk.msra.mxu1 %vm2058_vm2, %v1329_v59  ;;  %5660 = vmatprep.mubr.msk.f32.mxu0 %vm6069_vm1, %v6066_v26  ;;  %v1434_v35 = vrot.slane %v1426_v38, %v6287_v44  ;;  %v814_v4 = vrot.slane %v806_v1, %v6287_v44  ;;  %v846_v54 = vrot.slane %v838_v8, %v6287_v44 }
 0x1f3   :  { %v789_v56 = vrot.slane %v5421_v22, %v6281_v37  ;;  %v805_v40 = vrot.slane %v5423_v53, %v6281_v37  ;;  %5665 = vmatprep.mubr.msk.f32.mxu1 %vm6069_vm1, %v6066_v26  ;;  %v740_v0 = vcombine.low %v701_v41, %v733_v51  ;;  %v741_v42 = vcombine.high %v701_v41, %v733_v51  ;;  %v1467_v3 = vpop.permute.xlu1 %1466 }
 0x1f4   :  { %v1442_v38 = vcombine.low %v6571_v55, %v6574_v10  ;;  %5668 = vmatprep.subr.mxu0 %v6066_v26  ;;  %5673 = vmatprep.subr.mxu1 %v6066_v26  ;;  %v1458_v1 = vcombine.low %v1402_v52, %v1434_v35  ;;  %v1459_v6 = vcombine.high %v1402_v52, %v1434_v35 }
 0x1f5   :  { %v1443_v8 = vcombine.high %v6571_v55, %v6574_v10  ;;  %v822_v5 = vcombine.low %v6602_v45, %v6605_v20  ;;  %5661 = vmatmul.mubr.msk.f32.vlgmr.msra.gmra.mrb[6].mxu0 %vm2058_vm2, %v740_v0  ;;  %5666 = vmatmul.mubr.msk.f32.vlgmr.msra.gmra.mrb[10].mxu1 %vm2058_vm2, %v741_v42  ;;  %v870_v9 = vcombine.low %v814_v4, %v846_v54 }
 0x1f6   :  { %v854_v50 = vcombine.low %v789_v56, %v805_v40  ;;  %5669 = vmatpush3.xpose.msk.msra.mxu0 %vm2058_vm2, %v1458_v1  ;;  %5674 = vmatpush3.xpose.msk.msra.mxu1 %vm2058_vm2, %v1459_v6  ;;  %v1409_v63 = vrot.slane %v1395_v36, %v6287_v44  ;;  %v1441_v55 = vrot.slane %v1427_v39, %v6287_v44 }
 0x1f7   :  { %1494 = vrot.lane.b32.xlu1 %v6373_v18, %s6070_s14  ;;  %5670 = vmatprep.mubr.msk.f32.mxu0 %vm6069_vm1, %v6066_v26  ;;  %v871_v10 = vcombine.high %v814_v4, %v846_v54  ;;  %v821_v58 = vrot.slane %v807_v25, %v6287_v44  ;;  %v853_v13 = vrot.slane %v839_v32, %v6287_v44 }
 0x1f8   :  { %5675 = vmatprep.mubr.msk.f32.mxu1 %vm6069_vm1, %v6066_v26  ;;  %5678 = vmatprep.subr.mxu0 %v6066_v26  ;;  %v1460_v14 = vcombine.low %v1409_v63, %v1441_v55  ;;  %v1418_v15 = vrot.slane %v1410_v11, %v6287_v44  ;;  %v1450_v16 = vrot.slane %v1442_v38, %v6287_v44 }
 0x1f9   :  { %5683 = vmatprep.subr.mxu1 %v6066_v26  ;;  %5671 = vmatmul.mubr.msk.f32.vlgmr.msra.gmra.mrb[8].mxu0 %vm2058_vm2, %v870_v9  ;;  %v1461_v36 = vcombine.high %v1409_v63, %v1441_v55  ;;  %v830_v39 = vrot.slane %v822_v5, %v6287_v44  ;;  %v823_v46 = vcombine.high %v6602_v45, %v6605_v20 }
 0x1fa   :  { %5676 = vmatmul.mubr.msk.f32.vlgmr.msra.gmra.mrb[12].mxu1 %vm2058_vm2, %v871_v10  ;;  %5679 = vmatpush3.xpose.msk.msra.mxu0 %vm2058_vm2, %v1460_v14  ;;  %v862_v47 = vrot.slane %v854_v50, %v6287_v44  ;;  %v855_v48 = vcombine.high %v789_v56, %v805_v40  ;;  %v872_v49 = vcombine.low %v821_v58, %v853_v13 }
 0x1fb   :  { %5684 = vmatpush3.xpose.msk.msra.mxu1 %vm2058_vm2, %v1461_v36  ;;  %5680 = vmatprep.mubr.msk.f32.mxu0 %vm6069_vm1, %v6066_v26  ;;  %v873_v18 = vcombine.high %v821_v58, %v853_v13  ;;  %v1462_v25 = vcombine.low %v1418_v15, %v1450_v16  ;;  %v1425_v32 = vrot.slane %v1411_v17, %v6287_v44 }
 0x1fc   :  { %5685 = vmatprep.mubr.msk.f32.mxu1 %vm6069_vm1, %v6066_v26  ;;  %5688 = vmatprep.subr.mxu0 %v6066_v26  ;;  %v1457_v23 = vrot.slane %v1443_v8, %v6287_v44  ;;  %v1463_v29 = vcombine.high %v1418_v15, %v1450_v16  ;;  %v874_v30 = vcombine.low %v830_v39, %v862_v47 }
 0x1fd   :  { %5693 = vmatprep.subr.mxu1 %v6066_v26  ;;  %5681 = vmatmul.mubr.msk.f32.vlgmr.msra.gmra.mrb[10].mxu0 %vm2058_vm2, %v872_v49  ;;  %v875_v43 = vcombine.high %v830_v39, %v862_v47  ;;  %v837_v11 = vrot.slane %v823_v46, %v6287_v44  ;;  %v869_v31 = vrot.slane %v855_v48, %v6287_v44 }
 0x1fe   :  { %5686 = vmatmul.mubr.msk.f32.vlgmr.msra.gmra.mrb[14].mxu1 %vm2058_vm2, %v873_v18  ;;  %5689 = vmatpush3.xpose.msk.msra.mxu0 %vm2058_vm2, %v1462_v25  ;;  %v1464_v21 = vcombine.low %v1425_v32, %v1457_v23  ;;  %v1465_v41 = vcombine.high %v1425_v32, %v1457_v23 }
 0x1ff   :  { %5694 = vmatpush3.xpose.msk.msra.mxu1 %vm2058_vm2, %v1463_v29  ;;  %5690 = vmatprep.mubr.msk.f32.mxu0 %vm6069_vm1, %v6066_v26  ;;  %v876_v34 = vcombine.low %v837_v11, %v869_v31  ;;  %v877_v61 = vcombine.high %v837_v11, %v869_v31 }
 0x200   :  { %5695 = vmatprep.mubr.msk.f32.mxu1 %vm6069_vm1, %v6066_v26  ;;  %5698 = vmatprep.subr.mxu0 %v6066_v26 }
 0x201   :  { %5703 = vmatprep.subr.mxu1 %v6066_v26  ;;  %5691 = vmatmul.mubr.msk.f32.vlgmr.msra.gmra.mrb[12].mxu0 %vm2058_vm2, %v874_v30 }
 0x202   :  { %5696 = vmatmul.mubr.msk.f32.vlgmr.msra.gmra.mrb[16].mxu1 %vm2058_vm2, %v875_v43  ;;  %5699 = vmatpush3.xpose.msk.msra.mxu0 %vm2058_vm2, %v1464_v21 }
 0x203   :  { %5704 = vmatpush3.xpose.msk.msra.mxu1 %vm2058_vm2, %v1465_v41  ;;  %5700 = vmatprep.mubr.msk.f32.mxu0 %vm6069_vm1, %v6066_v26 }
 0x204   :  { %5705 = vmatprep.mubr.msk.f32.mxu1 %vm6069_vm1, %v6066_v26  ;;  %5708 = vmatprep.subr.mxu0 %v6066_v26 }
 0x205   :  { %5701 = vmatmul.mubr.msk.f32.vlgmr.msra.gmra.mrb[14].mxu0 %vm2058_vm2, %v876_v34  ;;  %5713 = vmatprep.subr.mxu1 %v6066_v26 }
 0x206   :  { %5706 = vmatmul.mubr.msk.f32.vlgmr.msra.gmra.mrb[18].mxu1 %vm2058_vm2, %v877_v61  ;;  %5710 = vmatprep.mubr.msk.f32.mxu0 %vm6069_vm1, %v6066_v26 }
 0x207   :  { %5715 = vmatprep.mubr.msk.f32.mxu1 %vm6069_vm1, %v6066_v26 }
 0x21f   :  { %v1477_v12 = vpop.permute.xlu1 %1476  ;;  %v1473_v51 = vpop.permute.xlu0 %1472 }
 0x220   :  { %v1650_v19 = vcombine.low %v1469_v62, %v1477_v12  ;;  %v1651_v24 = vcombine.high %v1469_v62, %v1477_v12 }
 0x222   :  { %v1658_v28 = vrot.slane %v1650_v19, %v6281_v37  ;;  %v1665_v17 = vrot.slane %v1651_v24, %v6281_v37 }
 0x223   :  { %v1481_v7 = vpop.permute.xlu1 %1480 }
 0x224   :  { %v1666_v27 = vcombine.low %v1473_v51, %v1481_v7  ;;  %v1667_v2 = vcombine.high %v1473_v51, %v1481_v7 }
 0x226   :  { %v1674_v59 = vrot.slane %v1666_v27, %v6281_v37  ;;  %v1681_v52 = vrot.slane %v1667_v2, %v6281_v37 }
 0x228   :  { %v1714_v45 = vcombine.low %v1658_v28, %v1674_v59  ;;  %v1715_v20 = vcombine.high %v1658_v28, %v1674_v59  ;;  %v1730_v22 = vcombine.low %v1665_v17, %v1681_v52  ;;  %v1731_v53 = vcombine.high %v1665_v17, %v1681_v52 }
 0x22a   :  { %v1722_v35 = vrot.slane %v1714_v45, %v6287_v44  ;;  %v1729_v4 = vrot.slane %v1715_v20, %v6287_v44  ;;  %v1738_v54 = vrot.slane %v1730_v22, %v6287_v44  ;;  %v1745_v56 = vrot.slane %v1731_v53, %v6287_v44 }
 0x22c   :  { %v5448_v40 = vcombine.low %v1722_v35, %v1729_v4  ;;  %v5450_v0 = vcombine.high %v1722_v35, %v1729_v4  ;;  %v5452_v42 = vcombine.low %v1738_v54, %v1745_v56  ;;  %v5454_v38 = vcombine.high %v1738_v54, %v1745_v56 }
 0x22e   :  { %v1930_v1 = vrot.slane %v5448_v40, %v6281_v37  ;;  %v1946_v6 = vrot.slane %v5450_v0, %v6281_v37  ;;  %v1962_v8 = vrot.slane %v5452_v42, %v6281_v37  ;;  %v1978_v5 = vrot.slane %v5454_v38, %v6281_v37 }
 0x22f   :  { %v6073_v38 = vmov 1966171168  }
 0x230   :  { %v1986_v9 = vcombine.low %v1930_v1, %v1946_v6  ;;  %v2018_v50 = vcombine.low %v1962_v8, %v1978_v5  ;;  %v1987_v63 = vcombine.high %v1930_v1, %v1946_v6  ;;  %v2019_v55 = vcombine.high %v1962_v8, %v1978_v5  ;;  %v5488_v5 = vld.sshfl [vmem:[%s7135_s2] sm:$0x11 pattern:$0x75316420]  ;;  %s6074_s2 = smov 12  }
 0x231   :  { %v3286_v1 = vunpack.c.l.s4 %v6073_v38 }
 0x232   :  { %v6722_v10 = vrot.slane %v1986_v9, %v6287_v44  ;;  %v6725_v58 = vrot.slane %v2018_v50, %v6287_v44  ;;  %v6728_v13 = vrot.slane %v1987_v63, %v6287_v44  ;;  %v6731_v14 = vrot.slane %v2019_v55, %v6287_v44 }
 0x233   :  { %v3287_v6 = vunpack.c.0.s8 %v3286_v1  ;;  %v3301_v50 = vsub.s32 0, %v6276_v33 }
 0x234   :  { %v2050_v15 = vcombine.low %v6722_v10, %v6725_v58  ;;  %v2051_v16 = vcombine.high %v6722_v10, %v6725_v58  ;;  %v2052_v36 = vcombine.low %v6728_v13, %v6731_v14  ;;  %v2053_v39 = vcombine.high %v6728_v13, %v6731_v14 }
 0x235   :  { %v3290_v8 = vsub.s32 %v3287_v6, %v6276_v33 }
 0x237   :  { %v3291_v9 = vrot.slane %v5488_v5, %v3290_v8 }
 0x239   :  { %v3302_v63 = vrot.slane %v3291_v9, %v3301_v50 }
 0x247   :  { %v6743_v47 = vpop.permute.xlu0 %1484 }
 0x24a   :  { %v6741_v46 = vpop.permute.xlu1 %1488 }
 0x24b   :  { %v1471_v25 = vpop.permute.xlu0 %1470 }
 0x252   :  { %v1475_v48 = vpop.permute.xlu1 %1474 }
 0x253   :  { %v1514_v49 = vcombine.low %v1467_v3, %v1475_v48  ;;  %v1515_v18 = vcombine.high %v1467_v3, %v1475_v48 }
 0x255   :  { %v1522_v30 = vrot.slane %v1514_v49, %v6281_v37  ;;  %v1529_v43 = vrot.slane %v1515_v18, %v6281_v37 }
 0x256   :  { %v1479_v32 = vpop.permute.xlu1 %1478 }
 0x257   :  { %v1530_v23 = vcombine.low %v1471_v25, %v1479_v32  ;;  %v1531_v29 = vcombine.high %v1471_v25, %v1479_v32 }
 0x259   :  { %v1538_v11 = vrot.slane %v1530_v23, %v6281_v37  ;;  %v1545_v31 = vrot.slane %v1531_v29, %v6281_v37 }
 0x25b   :  { %v1578_v21 = vcombine.low %v1522_v30, %v1538_v11  ;;  %v1579_v41 = vcombine.high %v1522_v30, %v1538_v11  ;;  %v1594_v34 = vcombine.low %v1529_v43, %v1545_v31  ;;  %v1595_v61 = vcombine.high %v1529_v43, %v1545_v31 }
 0x25d   :  { %v1586_v62 = vrot.slane %v1578_v21, %v6287_v44  ;;  %v1593_v3 = vrot.slane %v1579_v41, %v6287_v44  ;;  %v1602_v12 = vrot.slane %v1594_v34, %v6287_v44  ;;  %v1609_v19 = vrot.slane %v1595_v61, %v6287_v44 }
 0x25f   :  { %v5440_v24 = vcombine.low %v1586_v62, %v1593_v3  ;;  %v5442_v51 = vcombine.high %v1586_v62, %v1593_v3  ;;  %v5444_v7 = vcombine.low %v1602_v12, %v1609_v19  ;;  %v5446_v27 = vcombine.high %v1602_v12, %v1609_v19 }
 0x260   :  { %v3284_v3 = vcombine.high %v5488_v5, %v5488_v5 }
 0x261   :  { %v1794_v2 = vrot.slane %v5440_v24, %v6281_v37  ;;  %v1810_v28 = vrot.slane %v5442_v51, %v6281_v37  ;;  %v1826_v17 = vrot.slane %v5444_v7, %v6281_v37  ;;  %v1842_v59 = vrot.slane %v5446_v27, %v6281_v37 }
 0x262   :  { %v3298_v7 = vrot.slane %v3284_v3, %v3290_v8 }
 0x263   :  { %v1850_v52 = vcombine.low %v1794_v2, %v1810_v28  ;;  %v1882_v45 = vcombine.low %v1826_v17, %v1842_v59  ;;  %v1851_v20 = vcombine.high %v1794_v2, %v1810_v28  ;;  %v1883_v22 = vcombine.high %v1826_v17, %v1842_v59 }
 0x265   :  { %v1858_v53 = vrot.slane %v1850_v52, %v6287_v44  ;;  %v1890_v35 = vrot.slane %v1882_v45, %v6287_v44  ;;  %v6760_v4 = vrot.slane %v1851_v20, %v6287_v44  ;;  %v6763_v54 = vrot.slane %v1883_v22, %v6287_v44 }
 0x266   :  { %v3306_v20 = vrot.slane %v3298_v7, %v3301_v50 }
 0x267   :  { %v1914_v56 = vcombine.low %v1858_v53, %v1890_v35  ;;  %v1915_v40 = vcombine.high %v1858_v53, %v1890_v35  ;;  %v1916_v0 = vcombine.low %v6760_v4, %v6763_v54  ;;  %v1917_v42 = vcombine.high %v6760_v4, %v6763_v54 }
 0x269   :  { %5709 = vmatpush3.msra.mxu0 %v1914_v56  ;;  %5714 = vmatpush3.msra.mxu1 %v1915_v40 }
 0x26a   :  { %5718 = vmatprep.subr.mxu0 %v6066_v26  ;;  %5723 = vmatprep.subr.mxu1 %v6066_v26 }
 0x2ae   :  { %v2131_v55 = vpop.f32.mrb[2].mxu1 }
 0x2af   :  { %v6776_v48 = vadd.f32 %v3302_v63, %v2131_v55  ;;  %v5632_v49 = vpop.f32.mrb[3].mxu1 }
 0x2b1   :  { %v2283_v18 = vpop.f32.mrb[2].mxu0  ;;  %v3326_v25 = vsel %vm3325_vm3, %v6776_v48, -inf }
 0x2b2   :  { %v6780_v32 = vadd.f32 %v3302_v63, %v2283_v18  ;;  %v5642_v23 = vpop.f32.mrb[3].mxu0  ;;  %v2207_v29 = vpop.f32.mrb[4].mxu1  ;;  %3327 = vmax.xlane.f32.xlu0 %v3326_v25 }
 0x2b3   :  { %v6782_v30 = vadd.f32 %v3302_v63, %v2207_v29  ;;  %v5637_v43 = vpop.f32.mrb[5].mxu1 }
 0x2b4   :  { %v3332_v33 = vsel %vm3325_vm3, %v6780_v32, -inf }
 0x2b5   :  { %v3329_v11 = vsel %vm3325_vm3, %v6782_v30, -inf }
 0x2b6   :  { %3333 = vmax.xlane.f32.xlu0 %v3332_v33  ;;  %3330 = vmax.xlane.f32.xlu1 %v3329_v11 }
 0x2b8   :  { %v2359_v31 = vpop.f32.mrb[6].mxu1 }
 0x2b9   :  { %v6788_v21 = vadd.f32 %v3302_v63, %v2359_v31  ;;  %v5647_v41 = vpop.f32.mrb[7].mxu1 }
 0x2bb   :  { %v3335_v34 = vsel %vm3325_vm3, %v6788_v21, -inf }
 0x2bc   :  { %3336 = vmax.xlane.f32.xlu0 %v3335_v34 }
 0x2c3   :  { %v2435_v61 = vpop.f32.mrb[4].mxu0  ;;  %v2511_v62 = vpop.f32.mrb[8].mxu1 }
 0x2c4   :  { %v6792_v12 = vadd.f32 %v3302_v63, %v2435_v61  ;;  %v5652_v19 = vpop.f32.mrb[5].mxu0  ;;  %v5657_v24 = vpop.f32.mrb[9].mxu1  ;;  %v6800_v45 = vadd.f32 %v3302_v63, %v2511_v62 }
 0x2c6   :  { %v3338_v51 = vsel %vm3325_vm3, %v6792_v12, -inf  ;;  %v3341_v6 = vsel %vm3325_vm3, %v6800_v45, -inf }
 0x2c7   :  { %3339 = vmax.xlane.f32.xlu1 %v3338_v51 }
 0x2c8   :  { %v2587_v27 = vpop.f32.mrb[6].mxu0  ;;  %v2663_v2 = vpop.f32.mrb[10].mxu1 }
 0x2c9   :  { %v6796_v28 = vadd.f32 %v3302_v63, %v2587_v27  ;;  %v6798_v17 = vadd.f32 %v3302_v63, %v2663_v2  ;;  %v5662_v59 = vpop.f32.mrb[7].mxu0  ;;  %v5667_v52 = vpop.f32.mrb[11].mxu1 }
 0x2ca   :  { %v1483_v52 = vpop.permute.xlu1 %1482 }
 0x2cb   :  { %v3344_v22 = vsel %vm3325_vm3, %v6796_v28, -inf  ;;  %v3347_v53 = vsel %vm3325_vm3, %v6798_v17, -inf }
 0x2cc   :  { %3345 = vmax.xlane.f32.xlu0 %v3344_v22  ;;  %v2739_v35 = vpop.f32.mrb[8].mxu0  ;;  %3348 = vmax.xlane.f32.xlu1 %v3347_v53 }
 0x2cd   :  { %v2815_v56 = vpop.f32.mrb[12].mxu1  ;;  %v5672_v40 = vpop.f32.mrb[9].mxu0  ;;  %v6806_v1 = vadd.f32 %v3306_v20, %v2739_v35 }
 0x2ce   :  { %v5677_v38 = vpop.f32.mrb[13].mxu1  ;;  %v6818_v33 = vadd.f32 %v3306_v20, %v2815_v56  ;;  %v1491_v22 = vpop.permute.xlu1 %1490 }
 0x2cf   :  { %v3350_v49 = vsel %vm3325_vm3, %v6806_v1, -inf  ;;  %v1487_v35 = vpop.permute.xlu0 %1486  ;;  %v1546_v40 = vcombine.low %v1483_v52, %v1491_v22  ;;  %v1547_v38 = vcombine.high %v1483_v52, %v1491_v22 }
 0x2d0   :  { %3342 = vmax.xlane.f32.xlu0 %v3341_v6  ;;  %v2891_v8 = vpop.f32.mrb[10].mxu0  ;;  %v3353_v19 = vsel %vm3325_vm3, %v6818_v33, -inf }
 0x2d1   :  { %v2967_v5 = vpop.f32.mrb[14].mxu1  ;;  %v5682_v9 = vpop.f32.mrb[11].mxu0  ;;  %v6812_v55 = vadd.f32 %v3306_v20, %v2891_v8 }
 0x2d2   :  { %v6810_v50 = vadd.f32 %v3306_v20, %v2967_v5  ;;  %v5687_v63 = vpop.f32.mrb[15].mxu1  ;;  %v1495_v53 = vpop.permute.xlu1 %1494  ;;  %v1554_v5 = vrot.slane %v1546_v40, %v6281_v37  ;;  %v1561_v9 = vrot.slane %v1547_v38, %v6281_v37 }
 0x2d3   :  { %v3356_v11 = vsel %vm3325_vm3, %v6812_v55, -inf  ;;  %v1563_v56 = vcombine.high %v1487_v35, %v1495_v53 }
 0x2d4   :  { %3351 = vmax.xlane.f32.xlu0 %v3350_v49  ;;  %v3359_v18 = vsel %vm3325_vm3, %v6810_v50, -inf  ;;  %v3043_v25 = vpop.f32.mrb[12].mxu0 }
 0x2d5   :  { %3360 = vmax.xlane.f32.xlu1 %v3359_v18  ;;  %v3119_v23 = vpop.f32.mrb[16].mxu1  ;;  %v5692_v29 = vpop.f32.mrb[13].mxu0  ;;  %v6824_v3 = vadd.f32 %v3306_v20, %v3043_v25  ;;  %v1577_v8 = vrot.slane %v1563_v56, %v6281_v37 }
 0x2d6   :  { %v5697_v43 = vpop.f32.mrb[17].mxu1  ;;  %v6834_v27 = vadd.f32 %v3306_v20, %v3119_v23 }
 0x2d7   :  { %v3362_v7 = vsel %vm3325_vm3, %v6824_v3, -inf  ;;  %v1626_v49 = vcombine.low %v1561_v9, %v1577_v8 }
 0x2d8   :  { %3357 = vmax.xlane.f32.xlu0 %v3356_v11  ;;  %v3195_v31 = vpop.f32.mrb[14].mxu0  ;;  %v3365_v59 = vsel %vm3325_vm3, %v6834_v27, -inf }
 0x2d9   :  { %v3271_v41 = vpop.f32.mrb[18].mxu1  ;;  %v5702_v34 = vpop.f32.mrb[15].mxu0  ;;  %v6830_v51 = vadd.f32 %v3306_v20, %v3195_v31  ;;  %v1634_v23 = vrot.slane %v1626_v49, %v6287_v44 }
 0x2da   :  { %v6822_v61 = vadd.f32 %v3306_v20, %v3271_v41  ;;  %v5707_v62 = vpop.f32.mrb[19].mxu1  ;;  %v1562_v20 = vcombine.low %v1487_v35, %v1495_v53 }
 0x2db   :  { %v3368_v2 = vsel %vm3325_vm3, %v6830_v51, -inf }
 0x2dc   :  { %3354 = vmax.xlane.f32.xlu0 %v3353_v19  ;;  %v3371_v24 = vsel %vm3325_vm3, %v6822_v61, -inf  ;;  %v1570_v6 = vrot.slane %v1562_v20, %v6281_v37 }
 0x2dd   :  { %3372 = vmax.xlane.f32.xlu1 %v3371_v24 }
 0x2de   :  { %v1611_v63 = vcombine.high %v1554_v5, %v1570_v6 }
 0x2e0   :  { %3363 = vmax.xlane.f32.xlu0 %v3362_v7  ;;  %v1625_v25 = vrot.slane %v1611_v63, %v6287_v44 }
 0x2e4   :  { %3369 = vmax.xlane.f32.xlu0 %v3368_v2 }
 0x2e8   :  { %3366 = vmax.xlane.f32.xlu0 %v3365_v59 }
 0x2ee   :  { %1496 = vrot.lane.b32.xlu1 %v6461_v60, %s6070_s14  ;;  %v1610_v60 = vcombine.low %v1554_v5, %v1570_v6 }
 0x2f0   :  { %v1618_v18 = vrot.slane %v1610_v60, %v6287_v44 }
 0x2f2   :  { %v5441_v31 = vcombine.low %v1618_v18, %v1625_v25  ;;  %v5443_v41 = vcombine.high %v1618_v18, %v1625_v25 }
 0x2f4   :  { %v1801_v52 = vrot.slane %v5441_v31, %v6281_v37  ;;  %v1817_v22 = vrot.slane %v5443_v41, %v6281_v37 }
 0x2f6   :  { %v1866_v38 = vcombine.low %v1801_v52, %v1817_v22 }
 0x2fe   :  { %1492 = vrot.lane.b32.xlu0 %v6459_v57, %s6070_s14  ;;  %v1627_v57 = vcombine.high %v1561_v9, %v1577_v8 }
 0x300   :  { %v1641_v29 = vrot.slane %v1627_v57, %v6287_v44 }
 0x302   :  { %v5445_v34 = vcombine.low %v1634_v23, %v1641_v29  ;;  %v5447_v62 = vcombine.high %v1634_v23, %v1641_v29 }
 0x304   :  { %v1833_v53 = vrot.slane %v5445_v34, %v6281_v37 }
 0x33f   :  { %v3328_v43 = vpop.xlane.xlu0 %3327 }
 0x340   :  { %v3374_v11 = vsub.f32 %v6776_v48, %v3328_v43  ;;  %v1849_v48 = vrot.slane %v5447_v62, %v6281_v37  ;;  %v1867_v43 = vcombine.high %v1801_v52, %v1817_v22 }
 0x342   :  { %v3390_v19 = vmul.f32 1.442695, %v3374_v11  ;;  %v1898_v6 = vcombine.low %v1833_v53, %v1849_v48  ;;  %v1899_v11 = vcombine.high %v1833_v53, %v1849_v48 }
 0x343   :  { %v3334_v24 = vpop.xlane.xlu0 %3333  ;;  %v3331_v7 = vpop.xlane.xlu1 %3330 }
 0x344   :  { %5850 = vpow2.f32 %v3390_v19  ;;  %v3376_v2 = vsub.f32 %v6780_v32, %v3334_v24  ;;  %v3375_v59 = vsub.f32 %v6782_v30, %v3331_v7  ;;  %v1874_v30 = vrot.slane %v1866_v38, %v6287_v44 }
 0x345   :  { %v1906_v5 = vrot.slane %v1898_v6, %v6287_v44  ;;  %v1881_v19 = vrot.slane %v1867_v43, %v6287_v44 }
 0x346   :  { %v3394_v35 = vmul.f32 1.442695, %v3376_v2  ;;  %v3392_v20 = vmul.f32 1.442695, %v3375_v59 }
 0x347   :  { %v1918_v60 = vcombine.low %v1874_v30, %v1906_v5  ;;  %v1919_v29 = vcombine.high %v1874_v30, %v1906_v5 }
 0x348   :  { %5852 = vpow2.f32 %v3394_v35 }
 0x349   :  { %5854 = vpow2.f32 %v3392_v20  ;;  %v3337_v56 = vpop.xlane.xlu0 %3336 }
 0x34a   :  { %v3377_v40 = vsub.f32 %v6788_v21, %v3337_v56 }
 0x34c   :  { %v3396_v32 = vmul.f32 1.442695, %v3377_v40 }
 0x34e   :  { %v5851_v8 = vpop.eup %5850  ;;  %5856 = vpow2.f32 %v3396_v32 }
 0x34f   :  { %5711 = vmatmul.mubr.msk.f32.vlgmr.msra.gmra.mrb[16].mxu0 %vm3325_vm3, %v5851_v8  ;;  %v3422_v9 = vsel %vm3325_vm3, %v5851_v8, 0.0 }
 0x350   :  { %5719 = vmatpush3.msra.mxu0 %v1916_v0  ;;  %3423 = vadd.xlane.f32.xlu0 %v3422_v9 }
 0x351   :  { %5720 = vmatprep.mubr.msk.f32.mxu0 %vm6069_vm1, %v6066_v26  ;;  %5728 = vmatprep.subr.mxu0 %v6066_v26 }
 0x352   :  { %v5853_v21 = vpop.eup %5852 }
 0x353   :  { %v5855_v63 = vpop.eup %5854  ;;  %5721 = vmatmul.mubr.msk.f32.vlgmr.msra.gmra.mrb[18].mxu0 %vm3325_vm3, %v5853_v21  ;;  %v3428_v49 = vsel %vm3325_vm3, %v5853_v21, 0.0 }
 0x354   :  { %v3340_v57 = vpop.xlane.xlu1 %3339  ;;  %5716 = vmatmul.mubr.msk.f32.vlgmr.msra.gmra.mrb[20].mxu1 %vm3325_vm3, %v5855_v63  ;;  %5729 = vmatpush3.msra.mxu0 %v1918_v60  ;;  %v3425_v18 = vsel %vm3325_vm3, %v5855_v63, 0.0 }
 0x355   :  { %v3378_v0 = vsub.f32 %v6792_v12, %v3340_v57  ;;  %5724 = vmatpush3.msra.mxu1 %v1917_v42  ;;  %3429 = vadd.xlane.f32.xlu0 %v3428_v49 }
 0x356   :  { %3426 = vadd.xlane.f32.xlu1 %v3425_v18  ;;  %5725 = vmatprep.mubr.msk.f32.mxu1 %vm6069_vm1, %v6066_v26 }
 0x357   :  { %v3398_v25 = vmul.f32 1.442695, %v3378_v0  ;;  %5733 = vmatprep.subr.mxu1 %v6066_v26  ;;  %5730 = vmatprep.mubr.msk.f32.mxu0 %vm6069_vm1, %v6066_v26 }
 0x358   :  { %v5857_v23 = vpop.eup %5856  ;;  %5738 = vmatprep.subr.mxu0 %v6066_v26 }
 0x359   :  { %5858 = vpow2.f32 %v3398_v25  ;;  %v3346_v12 = vpop.xlane.xlu0 %3345  ;;  %5726 = vmatmul.mubr.msk.f32.vlgmr.msra.gmra.mrb[22].mxu1 %vm3325_vm3, %v5857_v23  ;;  %v3431_v4 = vsel %vm3325_vm3, %v5857_v23, 0.0  ;;  %v3349_v42 = vpop.xlane.xlu1 %3348 }
 0x35a   :  { %v3380_v54 = vsub.f32 %v6796_v28, %v3346_v12  ;;  %5734 = vmatpush3.msra.mxu1 %v1919_v29  ;;  %3432 = vadd.xlane.f32.xlu0 %v3431_v4  ;;  %v3381_v41 = vsub.f32 %v6798_v17, %v3349_v42  ;;  %v1913_v28 = vrot.slane %v1899_v11, %v6287_v44 }
 0x35b   :  { %5735 = vmatprep.mubr.msk.f32.mxu1 %vm6069_vm1, %v6066_v26  ;;  %5743 = vmatprep.subr.mxu1 %v6066_v26 }
 0x35c   :  { %v3402_v31 = vmul.f32 1.442695, %v3380_v54  ;;  %v3404_v7 = vmul.f32 1.442695, %v3381_v41  ;;  %v1920_v22 = vcombine.low %v1881_v19, %v1913_v28  ;;  %v1921_v8 = vcombine.high %v1881_v19, %v1913_v28 }
 0x35d   :  { %v3343_v34 = vpop.xlane.xlu0 %3342 }
 0x35e   :  { %5860 = vpow2.f32 %v3402_v31  ;;  %v3379_v62 = vsub.f32 %v6800_v45, %v3343_v34 }
 0x360   :  { %v3400_v24 = vmul.f32 1.442695, %v3379_v62 }
 0x361   :  { %v3352_v2 = vpop.xlane.xlu0 %3351 }
 0x362   :  { %5862 = vpow2.f32 %v3400_v24  ;;  %v3382_v59 = vsub.f32 %v6806_v1, %v3352_v2  ;;  %v3361_v48 = vpop.xlane.xlu1 %3360 }
 0x363   :  { %v5859_v52 = vpop.eup %5858  ;;  %5864 = vpow2.f32 %v3404_v7  ;;  %v3385_v20 = vsub.f32 %v6810_v50, %v3361_v48 }
 0x364   :  { %v3406_v53 = vmul.f32 1.442695, %v3382_v59  ;;  %5731 = vmatmul.mubr.msk.f32.vlgmr.msra.gmra.mrb[20].mxu0 %vm3325_vm3, %v5859_v52  ;;  %v3434_v17 = vsel %vm3325_vm3, %v5859_v52, 0.0 }
 0x365   :  { %v3358_v45 = vpop.xlane.xlu0 %3357  ;;  %5739 = vmatpush3.msra.mxu0 %v1920_v22  ;;  %3435 = vadd.xlane.f32.xlu1 %v3434_v17 }
 0x366   :  { %5866 = vpow2.f32 %v3406_v53  ;;  %v3384_v35 = vsub.f32 %v6812_v55, %v3358_v45  ;;  %5740 = vmatprep.mubr.msk.f32.mxu0 %vm6069_vm1, %v6066_v26  ;;  %5748 = vmatprep.subr.mxu0 %v6066_v26  ;;  %v3412_v55 = vmul.f32 1.442695, %v3385_v20 }
 0x368   :  { %v5861_v1 = vpop.eup %5860  ;;  %v3410_v56 = vmul.f32 1.442695, %v3384_v35 }
 0x369   :  { %v3355_v40 = vpop.xlane.xlu0 %3354  ;;  %5741 = vmatmul.mubr.msk.f32.vlgmr.msra.gmra.mrb[22].mxu0 %vm3325_vm3, %v5861_v1  ;;  %v3440_v38 = vsel %vm3325_vm3, %v5861_v1, 0.0 }
 0x36a   :  { %5868 = vpow2.f32 %v3410_v56  ;;  %v3383_v6 = vsub.f32 %v6818_v33, %v3355_v40  ;;  %5749 = vmatpush3.msra.mxu0 %v2050_v15  ;;  %3441 = vadd.xlane.f32.xlu1 %v3440_v38  ;;  %v3373_v9 = vpop.xlane.xlu1 %3372 }
 0x36b   :  { %5750 = vmatprep.mubr.msk.f32.mxu0 %vm6069_vm1, %v6066_v26  ;;  %5758 = vmatprep.subr.mxu0 %v6066_v26  ;;  %v3389_v18 = vsub.f32 %v6822_v61, %v3373_v9 }
 0x36c   :  { %v5863_v50 = vpop.eup %5862  ;;  %v3408_v32 = vmul.f32 1.442695, %v3383_v6 }
 0x36d   :  { %v3364_v30 = vpop.xlane.xlu0 %3363  ;;  %5736 = vmatmul.mubr.msk.f32.vlgmr.msra.gmra.mrb[24].mxu1 %vm3325_vm3, %v5863_v50  ;;  %v3437_v5 = vsel %vm3325_vm3, %v5863_v50, 0.0  ;;  %v5865_v15 = vpop.eup %5864  ;;  %v3420_v61 = vmul.f32 1.442695, %v3389_v18 }
 0x36e   :  { %5870 = vpow2.f32 %v3408_v32  ;;  %v3386_v33 = vsub.f32 %v6824_v3, %v3364_v30  ;;  %5744 = vmatpush3.msra.mxu1 %v1921_v8  ;;  %3438 = vadd.xlane.f32.xlu0 %v3437_v5  ;;  %v3443_v57 = vsel %vm3325_vm3, %v5865_v15, 0.0  ;;  %v1497_v10 = vpop.permute.xlu1 %1496 }
 0x36f   :  { %5745 = vmatprep.mubr.msk.f32.mxu1 %vm6069_vm1, %v6066_v26  ;;  %5753 = vmatprep.subr.mxu1 %v6066_v26  ;;  %5872 = vpow2.f32 %v3412_v55  ;;  %v1698_v23 = vcombine.low %v6741_v46, %v1497_v10  ;;  %v1699_v29 = vcombine.high %v6741_v46, %v1497_v10 }
 0x370   :  { %v5867_v21 = vpop.eup %5866  ;;  %v3414_v60 = vmul.f32 1.442695, %v3386_v33 }
 0x371   :  { %v3370_v63 = vpop.xlane.xlu0 %3369  ;;  %5746 = vmatmul.mubr.msk.f32.vlgmr.msra.gmra.mrb[26].mxu1 %vm3325_vm3, %v5865_v15  ;;  %5751 = vmatmul.mubr.msk.f32.vlgmr.msra.gmra.mrb[24].mxu0 %vm3325_vm3, %v5867_v21  ;;  %v3446_v49 = vsel %vm3325_vm3, %v5867_v21, 0.0  ;;  %v1706_v11 = vrot.slane %v1698_v23, %v6281_v37  ;;  %v1713_v31 = vrot.slane %v1699_v29, %v6281_v37 }
 0x372   :  { %5874 = vpow2.f32 %v3414_v60  ;;  %v3388_v3 = vsub.f32 %v6830_v51, %v3370_v63  ;;  %5754 = vmatpush3.msra.mxu1 %v2051_v16  ;;  %5759 = vmatpush3.msra.mxu0 %v2052_v36 }
 0x373   :  { %3447 = vadd.xlane.f32.xlu1 %v3446_v49  ;;  %3444 = vadd.xlane.f32.xlu0 %v3443_v57 }
 0x374   :  { %v5869_v0 = vpop.eup %5868  ;;  %v3418_v25 = vmul.f32 1.442695, %v3388_v3  ;;  %5760 = vmatprep.mubr.msk.f32.mxu0 %vm6069_vm1, %v6066_v26  ;;  %5755 = vmatprep.mubr.msk.f32.mxu1 %vm6069_vm1, %v6066_v26 }
 0x375   :  { %v3367_v58 = vpop.xlane.xlu0 %3366  ;;  %5761 = vmatmul.mubr.msk.f32.vlgmr.msra.gmra.mrb[26].mxu0 %vm3325_vm3, %v5869_v0  ;;  %v3452_v16 = vsel %vm3325_vm3, %v5869_v0, 0.0  ;;  %5763 = vmatprep.subr.mxu1 %v6066_v26 }
 0x376   :  { %5876 = vpow2.f32 %v3418_v25  ;;  %v3387_v36 = vsub.f32 %v6834_v27, %v3367_v58  ;;  %5768 = vmatprep.subr.mxu0 %v6066_v26  ;;  %5770 = vmatprep.mubr.msk.f32.mxu0 %vm6069_vm1, %v6066_v26 }
 0x377   :  { %3453 = vadd.xlane.f32.xlu1 %v3452_v16 }
 0x378   :  { %v5871_v51 = vpop.eup %5870  ;;  %v3416_v12 = vmul.f32 1.442695, %v3387_v36 }
 0x379   :  { %v1493_v4 = vpop.permute.xlu0 %1492  ;;  %5756 = vmatmul.mubr.msk.f32.vlgmr.msra.gmra.mrb[28].mxu1 %vm3325_vm3, %v5871_v51  ;;  %v3449_v54 = vsel %vm3325_vm3, %v5871_v51, 0.0  ;;  %v5873_v42 = vpop.eup %5872 }
 0x37a   :  { %5878 = vpow2.f32 %v3416_v12  ;;  %v1682_v27 = vcombine.low %v6743_v47, %v1493_v4  ;;  %v1683_v43 = vcombine.high %v6743_v47, %v1493_v4  ;;  %5764 = vmatpush3.msra.mxu1 %v2053_v39  ;;  %3450 = vadd.xlane.f32.xlu0 %v3449_v54  ;;  %v3455_v14 = vsel %vm3325_vm3, %v5873_v42, 0.0 }
 0x37b   :  { %5880 = vpow2.f32 %v3420_v61  ;;  %5765 = vmatprep.mubr.msk.f32.mxu1 %vm6069_vm1, %v6066_v26  ;;  %5773 = vmatprep.subr.mxu1 %v6066_v26 }
 0x37c   :  { %v5875_v46 = vpop.eup %5874  ;;  %v1690_v41 = vrot.slane %v1682_v27, %v6281_v37  ;;  %v1697_v47 = vrot.slane %v1683_v43, %v6281_v37 }
 0x37d   :  { %5766 = vmatmul.mubr.msk.f32.vlgmr.msra.gmra.mrb[30].mxu1 %vm3325_vm3, %v5873_v42  ;;  %v3458_v13 = vsel %vm3325_vm3, %v5875_v46, 0.0 }
 0x37e   :  { %v1746_v39 = vcombine.low %v1690_v41, %v1706_v11  ;;  %v1747_v34 = vcombine.high %v1690_v41, %v1706_v11  ;;  %v1762_v62 = vcombine.low %v1697_v47, %v1713_v31  ;;  %v1763_v19 = vcombine.high %v1697_v47, %v1713_v31  ;;  %3459 = vadd.xlane.f32.xlu1 %v3458_v13 }
 0x37f   :  { %3456 = vadd.xlane.f32.xlu0 %v3455_v14  ;;  %5775 = vmatprep.mubr.msk.f32.mxu1 %vm6069_vm1, %v6066_v26 }
 0x380   :  { %v5877_v28 = vpop.eup %5876  ;;  %v1754_v24 = vrot.slane %v1746_v39, %v6287_v44  ;;  %v1761_v7 = vrot.slane %v1747_v34, %v6287_v44  ;;  %v1770_v2 = vrot.slane %v1762_v62, %v6287_v44  ;;  %v1777_v59 = vrot.slane %v1763_v19, %v6287_v44 }
 0x381   :  { %v3464_v52 = vsel %vm3325_vm3, %v5877_v28, 0.0 }
 0x382   :  { %v5449_v22 = vcombine.low %v1754_v24, %v1761_v7  ;;  %v5451_v53 = vcombine.high %v1754_v24, %v1761_v7  ;;  %v5453_v17 = vcombine.low %v1770_v2, %v1777_v59  ;;  %v5455_v48 = vcombine.high %v1770_v2, %v1777_v59  ;;  %3465 = vadd.xlane.f32.xlu1 %v3464_v52 }
 0x384   :  { %v5879_v45 = vpop.eup %5878  ;;  %v1937_v35 = vrot.slane %v5449_v22, %v6281_v37  ;;  %v1953_v1 = vrot.slane %v5451_v53, %v6281_v37  ;;  %v1969_v20 = vrot.slane %v5453_v17, %v6281_v37  ;;  %v1985_v56 = vrot.slane %v5455_v48, %v6281_v37 }
 0x385   :  { %v5881_v40 = vpop.eup %5880  ;;  %v3461_v38 = vsel %vm3325_vm3, %v5879_v45, 0.0 }
 0x386   :  { %3462 = vadd.xlane.f32.xlu0 %v3461_v38  ;;  %v2002_v6 = vcombine.low %v1937_v35, %v1953_v1  ;;  %v2034_v50 = vcombine.low %v1969_v20, %v1985_v56  ;;  %v2003_v55 = vcombine.high %v1937_v35, %v1953_v1  ;;  %v2035_v32 = vcombine.high %v1969_v20, %v1985_v56 }
 0x387   :  { %v3467_v5 = vsel %vm3325_vm3, %v5881_v40, 0.0 }
 0x388   :  { %v2010_v8 = vrot.slane %v2002_v6, %v6287_v44  ;;  %v2042_v30 = vrot.slane %v2034_v50, %v6287_v44  ;;  %v2017_v33 = vrot.slane %v2003_v55, %v6287_v44  ;;  %v2049_v15 = vrot.slane %v2035_v32, %v6287_v44 }
 0x38a   :  { %3468 = vadd.xlane.f32.xlu0 %v3467_v5  ;;  %v2054_v9 = vcombine.low %v2010_v8, %v2042_v30  ;;  %v2055_v21 = vcombine.high %v2010_v8, %v2042_v30  ;;  %v2056_v60 = vcombine.low %v2017_v33, %v2049_v15  ;;  %v2057_v63 = vcombine.high %v2017_v33, %v2049_v15 }
 0x38c   :  { %5769 = vmatpush3.msra.mxu0 %v2054_v9  ;;  %5774 = vmatpush3.msra.mxu1 %v2055_v21 }
 0x38d   :  { %5771 = vmatmul.mubr.msk.f32.vlgmr.msra.gmra.mrb[28].mxu0 %vm3325_vm3, %v5875_v46  ;;  %5776 = vmatmul.mubr.msk.f32.vlgmr.msra.gmra.mrb[32].mxu1 %vm3325_vm3, %v5879_v45 }
 0x38e   :  { %5778 = vmatprep.subr.mxu0 %v6066_v26  ;;  %5783 = vmatprep.subr.mxu1 %v6066_v26 }
 0x38f   :  { %5779 = vmatpush3.msra.mxu0 %v2056_v60  ;;  %5784 = vmatpush3.msra.mxu1 %v2057_v63 }
 0x390   :  { %5780 = vmatprep.mubr.msk.f32.mxu0 %vm6069_vm1, %v6066_v26  ;;  %5785 = vmatprep.mubr.msk.f32.mxu1 %vm6069_vm1, %v6066_v26 }
 0x391   :  { %5781 = vmatmul.mubr.msk.f32.vlgmr.msra.gmra.mrb[30].mxu0 %vm3325_vm3, %v5877_v28  ;;  %5786 = vmatmul.mubr.msk.f32.vlgmr.msra.gmra.mrb[34].mxu1 %vm3325_vm3, %v5881_v40 }
 0x3dd   :  { %v3424_v49 = vpop.xlane.xlu0 %3423 }
 0x3de   :  { %5882 = vrcp.f32 %v3424_v49 }
 0x3e2   :  { %v3430_v3 = vpop.xlane.xlu0 %3429 }
 0x3e3   :  { %5884 = vrcp.f32 %v3430_v3  ;;  %v3427_v57 = vpop.xlane.xlu1 %3426 }
 0x3e4   :  { %5886 = vrcp.f32 %v3427_v57 }
 0x3e7   :  { %v3433_v18 = vpop.xlane.xlu0 %3432 }
 0x3e8   :  { %5888 = vrcp.f32 %v3433_v18  ;;  %v5883_v10 = vpop.eup %5882 }
 0x3ed   :  { %v5885_v58 = vpop.eup %5884 }
 0x3ee   :  { %v5887_v54 = vpop.eup %5886 }
 0x3f2   :  { %v3436_v29 = vpop.xlane.xlu1 %3435  ;;  %v5889_v42 = vpop.eup %5888 }
 0x3f3   :  { %5890 = vrcp.f32 %v3436_v29 }
 0x3f7   :  { %v3442_v31 = vpop.xlane.xlu1 %3441 }
 0x3f8   :  { %5892 = vrcp.f32 %v3442_v31 }
 0x3fb   :  { %v3439_v13 = vpop.xlane.xlu0 %3438 }
 0x3fc   :  { %5894 = vrcp.f32 %v3439_v13 }
 0x3fd   :  { %v5891_v55 = vpop.eup %5890 }
 0x400   :  { %v3448_v2 = vpop.xlane.xlu1 %3447  ;;  %v3445_v17 = vpop.xlane.xlu0 %3444 }
 0x401   :  { %5896 = vrcp.f32 %v3445_v17 }
 0x402   :  { %v5893_v15 = vpop.eup %5892  ;;  %5898 = vrcp.f32 %v3448_v2 }
 0x404   :  { %v3454_v32 = vpop.xlane.xlu1 %3453 }
 0x405   :  { %5900 = vrcp.f32 %v3454_v32 }
 0x407   :  { %v3451_v60 = vpop.xlane.xlu0 %3450 }
 0x408   :  { %5902 = vrcp.f32 %v3451_v60 }
 0x40c   :  { %v3457_v29 = vpop.xlane.xlu0 %3456 }
 0x40d   :  { %5904 = vrcp.f32 %v3457_v29 }
 0x422   :  { %v3539_v0 = vpop.f32.mrb[16].mxu0 }
 0x423   :  { %v5712_v25 = vpop.f32.mrb[17].mxu0  ;;  %v4654_v36 = vmul.f32 %v5883_v10, %v3539_v0 }
 0x426   :  { %v3685_v16 = vpop.f32.mrb[18].mxu0 }
 0x427   :  { %v3612_v61 = vpop.f32.mrb[20].mxu1  ;;  %v4656_v26 = vmul.f32 %v5885_v58, %v3685_v16  ;;  %v5722_v51 = vpop.f32.mrb[19].mxu0 }
 0x428   :  { %v5717_v23 = vpop.f32.mrb[21].mxu1  ;;  %v4655_v43 = vmul.f32 %v5887_v54, %v3612_v61 }
 0x429   :  { %v4670_v12 = vcombine.low %v4654_v36, %v4656_v26  ;;  %v4671_v4 = vcombine.high %v4654_v36, %v4656_v26  ;;  %v5895_v23 = vpop.eup %5894 }
 0x42b   :  { %v4678_v14 = vrot.slane %v4670_v12, %v6281_v37  ;;  %v4685_v39 = vrot.slane %v4671_v4, %v6281_v37  ;;  %v5897_v12 = vpop.eup %5896 }
 0x42c   :  { %v3758_v27 = vpop.f32.mrb[22].mxu1 }
 0x42d   :  { %v4657_v46 = vmul.f32 %v5889_v42, %v3758_v27  ;;  %v5727_v11 = vpop.f32.mrb[23].mxu1 }
 0x42e   :  { %v5899_v11 = vpop.eup %5898 }
 0x42f   :  { %v4686_v41 = vcombine.low %v4655_v43, %v4657_v46  ;;  %v4687_v47 = vcombine.high %v4655_v43, %v4657_v46 }
 0x431   :  { %v4694_v34 = vrot.slane %v4686_v41, %v6281_v37  ;;  %v4701_v62 = vrot.slane %v4687_v47, %v6281_v37  ;;  %v5901_v47 = vpop.eup %5900 }
 0x433   :  { %v4734_v19 = vcombine.low %v4678_v14, %v4694_v34  ;;  %v4735_v28 = vcombine.high %v4678_v14, %v4694_v34  ;;  %v4750_v24 = vcombine.low %v4685_v39, %v4701_v62  ;;  %v4751_v7 = vcombine.high %v4685_v39, %v4701_v62  ;;  %v3460_v39 = vpop.xlane.xlu1 %3459 }
 0x434   :  { %5906 = vrcp.f32 %v3460_v39 }
 0x435   :  { %v4742_v59 = vrot.slane %v4734_v19, %v6287_v44  ;;  %v4749_v52 = vrot.slane %v4735_v28, %v6287_v44  ;;  %v4758_v22 = vrot.slane %v4750_v24, %v6287_v44  ;;  %v4765_v53 = vrot.slane %v4751_v7, %v6287_v44 }
 0x437   :  { %v5505_v48 = vcombine.low %v4742_v59, %v4749_v52  ;;  %v5507_v45 = vcombine.high %v4742_v59, %v4749_v52  ;;  %v5509_v35 = vcombine.low %v4758_v22, %v4765_v53  ;;  %v5511_v1 = vcombine.high %v4758_v22, %v4765_v53  ;;  %v3831_v20 = vpop.f32.mrb[20].mxu0 }
 0x438   :  { %v5732_v56 = vpop.f32.mrb[21].mxu0  ;;  %v4658_v9 = vmul.f32 %v5891_v55, %v3831_v20 }
 0x439   :  { %v4950_v40 = vrot.slane %v5505_v48, %v6281_v37  ;;  %v4966_v38 = vrot.slane %v5507_v45, %v6281_v37  ;;  %v4982_v6 = vrot.slane %v5509_v35, %v6281_v37  ;;  %v4998_v50 = vrot.slane %v5511_v1, %v6281_v37 }
 0x43b   :  { %v5007_v8 = vcombine.high %v4950_v40, %v4966_v38  ;;  %v5039_v30 = vcombine.high %v4982_v6, %v4998_v50  ;;  %v5006_v5 = vcombine.low %v4950_v40, %v4966_v38  ;;  %v5038_v33 = vcombine.low %v4982_v6, %v4998_v50  ;;  %v5903_v40 = vpop.eup %5902  ;;  %v3466_v38 = vpop.xlane.xlu1 %3465 }
 0x43c   :  { %v3977_v21 = vpop.f32.mrb[22].mxu0  ;;  %5908 = vrcp.f32 %v3466_v38 }
 0x43d   :  { %v4660_v63 = vmul.f32 %v5893_v15, %v3977_v21  ;;  %v5742_v49 = vpop.f32.mrb[23].mxu0  ;;  %v5021_v3 = vrot.slane %v5007_v8, %v6287_v44  ;;  %v5053_v57 = vrot.slane %v5039_v30, %v6287_v44  ;;  %v7001_v18 = vrot.slane %v5006_v5, %v6287_v44  ;;  %v5905_v8 = vpop.eup %5904 }
 0x43e   :  { %v7004_v0 = vrot.slane %v5038_v33, %v6287_v44  ;;  %v3463_v33 = vpop.xlane.xlu0 %3462 }
 0x43f   :  { %v4702_v25 = vcombine.low %v4658_v9, %v4660_v63  ;;  %v4703_v10 = vcombine.high %v4658_v9, %v4660_v63  ;;  %v5073_v58 = vcombine.high %v5021_v3, %v5053_v57  ;;  %v5072_v16 = vcombine.low %v5021_v3, %v5053_v57 }
 0x440   :  { %v3904_v36 = vpop.f32.mrb[24].mxu1  ;;  %v5071_v61 = vcombine.high %v7001_v18, %v7004_v0  ;;  %v5070_v26 = vcombine.low %v7001_v18, %v7004_v0  ;;  %5910 = vrcp.f32 %v3463_v33 }
 0x441   :  { %v5737_v51 = vpop.f32.mrb[25].mxu1  ;;  %5232 = vrot.lane.b32.xlu0 %v5073_v58, %s6074_s2  ;;  %v4659_v42 = vmul.f32 %v5895_v23, %v3904_v36  ;;  %v4710_v13 = vrot.slane %v4702_v25, %v6281_v37  ;;  %v4717_v34 = vrot.slane %v4703_v10, %v6281_v37 }
 0x442   :  { %5216 = vrot.lane.b32.xlu1 %v5071_v61, %s6075_s16 }
 0x444   :  { %v4050_v4 = vpop.f32.mrb[26].mxu1  ;;  %v4123_v54 = vpop.f32.mrb[24].mxu0 }
 0x445   :  { %v4661_v27 = vmul.f32 %v5897_v12, %v4050_v4  ;;  %v5747_v43 = vpop.f32.mrb[27].mxu1  ;;  %v5752_v46 = vpop.f32.mrb[25].mxu0  ;;  %v4662_v7 = vmul.f32 %v5899_v11, %v4123_v54 }
 0x446   :  { %5224 = vrot.lane.b32.xlu1 %v5072_v16, %s6057_s22 }
 0x447   :  { %v4718_v31 = vcombine.low %v4659_v42, %v4661_v27  ;;  %v4719_v41 = vcombine.high %v4659_v42, %v4661_v27  ;;  %v3469_v42 = vpop.xlane.xlu0 %3468 }
 0x448   :  { %v4269_v14 = vpop.f32.mrb[26].mxu0  ;;  %5912 = vrcp.f32 %v3469_v42 }
 0x449   :  { %v4726_v62 = vrot.slane %v4718_v31, %v6281_v37  ;;  %v4733_v19 = vrot.slane %v4719_v41, %v6281_v37  ;;  %v4664_v28 = vmul.f32 %v5901_v47, %v4269_v14  ;;  %v5762_v24 = vpop.f32.mrb[27].mxu0 }
 0x44b   :  { %v4766_v2 = vcombine.low %v4710_v13, %v4726_v62  ;;  %v4767_v59 = vcombine.high %v4710_v13, %v4726_v62  ;;  %v4782_v52 = vcombine.low %v4717_v34, %v4733_v19  ;;  %v4783_v22 = vcombine.high %v4717_v34, %v4733_v19  ;;  %v5907_v19 = vpop.eup %5906 }
 0x44c   :  { %v4806_v53 = vcombine.low %v4662_v7, %v4664_v28  ;;  %v4807_v17 = vcombine.high %v4662_v7, %v4664_v28  ;;  %v4196_v48 = vpop.f32.mrb[28].mxu1 }
 0x44d   :  { %v4774_v45 = vrot.slane %v4766_v2, %v6287_v44  ;;  %v4781_v35 = vrot.slane %v4767_v59, %v6287_v44  ;;  %v4790_v1 = vrot.slane %v4782_v52, %v6287_v44  ;;  %v4797_v20 = vrot.slane %v4783_v22, %v6287_v44  ;;  %v5757_v56 = vpop.f32.mrb[29].mxu1  ;;  %v5909_v59 = vpop.eup %5908 }
 0x44e   :  { %v4663_v30 = vmul.f32 %v5903_v40, %v4196_v48  ;;  %v4814_v58 = vrot.slane %v4806_v53, %v6281_v37  ;;  %v4821_v16 = vrot.slane %v4807_v17, %v6281_v37 }
 0x44f   :  { %v5506_v6 = vcombine.low %v4774_v45, %v4781_v35  ;;  %v5508_v50 = vcombine.high %v4774_v45, %v4781_v35  ;;  %v5510_v55 = vcombine.low %v4790_v1, %v4797_v20  ;;  %v5512_v32 = vcombine.high %v4790_v1, %v4797_v20  ;;  %v5911_v20 = vpop.eup %5910 }
 0x450   :  { %v4342_v5 = vpop.f32.mrb[30].mxu1 }
 0x451   :  { %v4665_v15 = vmul.f32 %v5905_v8, %v4342_v5  ;;  %v5767_v9 = vpop.f32.mrb[31].mxu1  ;;  %v4957_v21 = vrot.slane %v5506_v6, %v6281_v37  ;;  %v4973_v60 = vrot.slane %v5508_v50, %v6281_v37  ;;  %v4989_v63 = vrot.slane %v5510_v55, %v6281_v37 }
 0x452   :  { %v5005_v49 = vrot.slane %v5512_v32, %v6281_v37  ;;  %v5913_v33 = vpop.eup %5912 }
 0x453   :  { %v4822_v3 = vcombine.low %v4663_v30, %v4665_v15  ;;  %v4823_v57 = vcombine.high %v4663_v30, %v4665_v15  ;;  %v5022_v25 = vcombine.low %v4957_v21, %v4973_v60  ;;  %v5023_v10 = vcombine.high %v4957_v21, %v4973_v60 }
 0x454   :  { %v5054_v36 = vcombine.low %v4989_v63, %v5005_v49  ;;  %v5055_v61 = vcombine.high %v4989_v63, %v5005_v49 }
 0x455   :  { %v4830_v51 = vrot.slane %v4822_v3, %v6281_v37  ;;  %v4837_v23 = vrot.slane %v4823_v57, %v6281_v37  ;;  %v5030_v29 = vrot.slane %v5022_v25, %v6287_v44  ;;  %v7031_v12 = vrot.slane %v5023_v10, %v6287_v44 }
 0x456   :  { %v5062_v4 = vrot.slane %v5054_v36, %v6287_v44  ;;  %v7035_v54 = vrot.slane %v5055_v61, %v6287_v44 }
 0x457   :  { %v4870_v27 = vcombine.low %v4814_v58, %v4830_v51  ;;  %v4871_v43 = vcombine.high %v4814_v58, %v4830_v51  ;;  %v4886_v46 = vcombine.low %v4821_v16, %v4837_v23  ;;  %v4887_v11 = vcombine.high %v4821_v16, %v4837_v23 }
 0x458   :  { %v5074_v31 = vcombine.low %v5030_v29, %v5062_v4  ;;  %v5075_v41 = vcombine.high %v5030_v29, %v5062_v4  ;;  %v5076_v47 = vcombine.low %v7031_v12, %v7035_v54  ;;  %v5077_v13 = vcombine.high %v7031_v12, %v7035_v54  ;;  %v5291_v54 = vld [vmem:[#allocation10 + $0x10] sm:$0xff] }
 0x459   :  { %v4878_v14 = vrot.slane %v4870_v27, %v6287_v44  ;;  %v4885_v39 = vrot.slane %v4871_v43, %v6287_v44  ;;  %v4894_v34 = vrot.slane %v4886_v46, %v6287_v44  ;;  %v4901_v62 = vrot.slane %v4887_v11, %v6287_v44 }
 0x45a   :  { %5240 = vrot.lane.b32.xlu0 %v5074_v31, %s6076_s18 }
 0x45b   :  { %v5513_v28 = vcombine.low %v4878_v14, %v4885_v39  ;;  %v5515_v24 = vcombine.high %v4878_v14, %v4885_v39  ;;  %v5517_v7 = vcombine.low %v4894_v34, %v4901_v62  ;;  %v5519_v2 = vcombine.high %v4894_v34, %v4901_v62 }
 0x45d   :  { %v5086_v52 = vrot.slane %v5513_v28, %v6281_v37  ;;  %v5102_v22 = vrot.slane %v5515_v24, %v6281_v37  ;;  %v5118_v53 = vrot.slane %v5517_v7, %v6281_v37  ;;  %v5134_v17 = vrot.slane %v5519_v2, %v6281_v37  ;;  %v5290_v28 = vld [vmem:[#allocation10 + $0x8] sm:$0xff] }
 0x45e   :  { %5248 = vrot.lane.b32.xlu0 %v5075_v41, %s6077_s19 }
 0x45f   :  { %v5143_v48 = vcombine.high %v5086_v52, %v5102_v22  ;;  %v5175_v45 = vcombine.high %v5118_v53, %v5134_v17  ;;  %v5142_v35 = vcombine.low %v5086_v52, %v5102_v22  ;;  %v5174_v1 = vcombine.low %v5118_v53, %v5134_v17 }
 0x460   :  { %v4415_v56 = vpop.f32.mrb[28].mxu0  ;;  %v4488_v40 = vpop.f32.mrb[32].mxu1 }
 0x461   :  { %v5772_v38 = vpop.f32.mrb[29].mxu0  ;;  %v5777_v6 = vpop.f32.mrb[33].mxu1  ;;  %v5157_v50 = vrot.slane %v5143_v48, %v6287_v44  ;;  %v5189_v55 = vrot.slane %v5175_v45, %v6287_v44  ;;  %v7054_v32 = vrot.slane %v5142_v35, %v6287_v44  ;;  %v7057_v8 = vrot.slane %v5174_v1, %v6287_v44 }
 0x462   :  { %v4666_v63 = vmul.f32 %v5907_v19, %v4415_v56  ;;  %v4667_v49 = vmul.f32 %v5911_v20, %v4488_v40  ;;  %v5289_v19 = vld [vmem:[#allocation10] sm:$0xff] }
 0x463   :  { %v5208_v30 = vcombine.low %v5157_v50, %v5189_v55  ;;  %v5209_v5 = vcombine.high %v5157_v50, %v5189_v55  ;;  %v5207_v21 = vcombine.high %v7054_v32, %v7057_v8  ;;  %v5206_v60 = vcombine.low %v7054_v32, %v7057_v8  ;;  %v5521_v32 = vld [vmem:[%s7141_s8] ss:$0 sm:$0xff] }
 0x464   :  { %v4561_v15 = vpop.f32.mrb[30].mxu0  ;;  %v4634_v9 = vpop.f32.mrb[34].mxu1  ;;  %v5815_v52 = vpack.c.bf16 %v5290_v28, %v5289_v19 }
 0x465   :  { %v4668_v3 = vmul.f32 %v5909_v59, %v4561_v15  ;;  %v4669_v57 = vmul.f32 %v5913_v33, %v4634_v9  ;;  %v5782_v25 = vpop.f32.mrb[31].mxu0  ;;  %v5787_v10 = vpop.f32.mrb[35].mxu1  ;;  %5226 = vrot.lane.b32.xlu1 %v5208_v30, %s6057_s22  ;;  %5218 = vrot.lane.b32.xlu0 %v5207_v21, %s6075_s16 }
 0x466   :  { %5816 = vmatprep.subr.bf16.mxu0 %v5815_v52 }
 0x467   :  { %v4838_v58 = vcombine.low %v4666_v63, %v4668_v3  ;;  %v4839_v16 = vcombine.high %v4666_v63, %v4668_v3  ;;  %v4854_v36 = vcombine.low %v4667_v49, %v4669_v57  ;;  %v4855_v61 = vcombine.high %v4667_v49, %v4669_v57  ;;  %5818 = vmatpush3.bf16.msra.mxu0 %v5815_v52 }
 0x469   :  { %v4846_v51 = vrot.slane %v4838_v58, %v6281_v37  ;;  %v4853_v23 = vrot.slane %v4839_v16, %v6281_v37  ;;  %v4862_v29 = vrot.slane %v4854_v36, %v6281_v37  ;;  %v4869_v4 = vrot.slane %v4855_v61, %v6281_v37  ;;  %5234 = vrot.lane.b32.xlu1 %v5209_v5, %s6074_s2 }
 0x46a   :  { %5256 = vrot.lane.b32.xlu0 %v5076_v47, %s6078_s20 }
 0x46b   :  { %v4902_v42 = vcombine.low %v4846_v51, %v4862_v29  ;;  %v4903_v27 = vcombine.high %v4846_v51, %v4862_v29  ;;  %v4918_v43 = vcombine.low %v4853_v23, %v4869_v4  ;;  %v4919_v46 = vcombine.high %v4853_v23, %v4869_v4 }
 0x46d   :  { %v4910_v11 = vrot.slane %v4902_v42, %v6287_v44  ;;  %v4917_v31 = vrot.slane %v4903_v27, %v6287_v44  ;;  %v4926_v41 = vrot.slane %v4918_v43, %v6287_v44  ;;  %v4933_v14 = vrot.slane %v4919_v46, %v6287_v44 }
 0x46e   :  { %5264 = vrot.lane.b32.xlu0 %v5077_v13, %s6079_s23  ;;  %v5292_v13 = vld [vmem:[#allocation10 + $0x18] sm:$0xff] }
 0x46f   :  { %v5514_v39 = vcombine.low %v4910_v11, %v4917_v31  ;;  %v5516_v47 = vcombine.high %v4910_v11, %v4917_v31  ;;  %v5518_v34 = vcombine.low %v4926_v41, %v4933_v14  ;;  %v5520_v62 = vcombine.high %v4926_v41, %v4933_v14 }
 0x470   :  { %v5819_v20 = vpack.c.bf16 %v5292_v13, %v5291_v54 }
 0x471   :  { %v5093_v24 = vrot.slane %v5514_v39, %v6281_v37  ;;  %v5109_v7 = vrot.slane %v5516_v47, %v6281_v37  ;;  %v5125_v2 = vrot.slane %v5518_v34, %v6281_v37  ;;  %v5141_v59 = vrot.slane %v5520_v62, %v6281_v37 }
 0x472   :  { %5820 = vmatprep.subr.bf16.mxu0 %v5819_v20 }
 0x473   :  { %v5158_v22 = vcombine.low %v5093_v24, %v5109_v7  ;;  %v5190_v53 = vcombine.low %v5125_v2, %v5141_v59  ;;  %v5159_v17 = vcombine.high %v5093_v24, %v5109_v7  ;;  %v5191_v12 = vcombine.high %v5125_v2, %v5141_v59  ;;  %5822 = vmatpush3.bf16.msra.mxu0 %v5819_v20 }
 0x475   :  { %v5166_v48 = vrot.slane %v5158_v22, %v6287_v44  ;;  %v5198_v45 = vrot.slane %v5190_v53, %v6287_v44  ;;  %v5173_v35 = vrot.slane %v5159_v17, %v6287_v44  ;;  %v5205_v1 = vrot.slane %v5191_v12, %v6287_v44 }
 0x477   :  { %v5210_v56 = vcombine.low %v5166_v48, %v5198_v45  ;;  %v5211_v37 = vcombine.high %v5166_v48, %v5198_v45  ;;  %v5212_v40 = vcombine.low %v5173_v35, %v5205_v1  ;;  %v5213_v38 = vcombine.high %v5173_v35, %v5205_v1 }
 0x479   :  { %5242 = vrot.lane.b32.xlu1 %v5210_v56, %s6076_s18 }
 0x47d   :  { %5250 = vrot.lane.b32.xlu1 %v5211_v37, %s6077_s19 }
 0x481   :  { %5258 = vrot.lane.b32.xlu1 %v5212_v40, %s6078_s20 }
 0x485   :  { %5266 = vrot.lane.b32.xlu1 %v5213_v38, %s6079_s23 }
 0x4b3   :  { %v5233_v6 = vpop.permute.xlu0 %5232 }
 0x4b4   :  { %v5217_v55 = vpop.permute.xlu1 %5216 }
 0x4b5   :  { %v5270_v33 = vsel %vm2058_vm2, %v5070_v26, %v5217_v55 }
 0x4b8   :  { %v5225_v30 = vpop.permute.xlu1 %5224 }
 0x4b9   :  { %v5272_v15 = vsel %vm3325_vm3, %v5270_v33, %v5225_v30 }
 0x4ba   :  { %v5275_v21 = vsel %vm5274_vm4, %v5272_v15, %v5233_v6 }
 0x4cc   :  { %v5241_v50 = vpop.permute.xlu0 %5240 }
 0x4cd   :  { %v5278_v63 = vsel %vm5277_vm5, %v5275_v21, %v5241_v50 }
 0x4d0   :  { %v5249_v44 = vpop.permute.xlu0 %5248 }
 0x4d1   :  { %v5281_v49 = vsel %vm5280_vm6, %v5278_v63, %v5249_v44 }
 0x4d7   :  { %v5219_v5 = vpop.permute.xlu0 %5218  ;;  %v5227_v18 = vpop.permute.xlu1 %5226 }
 0x4d8   :  { %v5271_v58 = vsel %vm2058_vm2, %v5206_v60, %v5219_v5 }
 0x4d9   :  { %v5273_v16 = vsel %vm3325_vm3, %v5271_v58, %v5227_v18 }
 0x4db   :  { %v5235_v26 = vpop.permute.xlu1 %5234 }
 0x4dc   :  { %v5257_v9 = vpop.permute.xlu0 %5256  ;;  %v5276_v61 = vsel %vm5274_vm4, %v5273_v16, %v5235_v26 }
 0x4dd   :  { %v5284_v3 = vsel %vm5283_vm7, %v5281_v49, %v5257_v9 }
 0x4e0   :  { %v5265_v57 = vpop.permute.xlu0 %5264 }
 0x4e1   :  { %v5287_v0 = vsel %vm5286_vm8, %v5284_v3, %v5265_v57 }
 0x4e2   :  { %5796 = vmatprep.mubr.msk.f32.mxu0 %vm116_vm0, %v5287_v0 }
 0x4eb   :  { %v5243_v25 = vpop.permute.xlu1 %5242 }
 0x4ec   :  { %v5279_v51 = vsel %vm5277_vm5, %v5276_v61, %v5243_v25 }
 0x4ef   :  { %v5251_v10 = vpop.permute.xlu1 %5250 }
 0x4f0   :  { %v5282_v23 = vsel %vm5280_vm6, %v5279_v51, %v5251_v10 }
 0x4f3   :  { %v5259_v36 = vpop.permute.xlu1 %5258 }
 0x4f4   :  { %v5285_v29 = vsel %vm5283_vm7, %v5282_v23, %v5259_v36 }
 0x4f7   :  { %v5267_v4 = vpop.permute.xlu1 %5266 }
 0x4f8   :  { %v5288_v42 = vsel %vm5286_vm8, %v5285_v29, %v5267_v4 }
 0x4f9   :  { %5797 = vmatmul.mubr.msk.f32.vlgmr.msra.gmra.mrb[32].mxu0 %vm116_vm0, %v5288_v42 }
 0x5cc   :  { %v5798_v8 = vpop.f32.mrb[32].mxu0 }
 0x5cd   :  { %v5378_v60 = vadd.f32 %v5798_v8, %v5521_v32  ;;  %v5372_v27 = vpop.f32.mrb[33].mxu0 }
 0x5ce   :  { %v5373_v43 = vadd.f32 %v5521_v32, %v5372_v27 }
 0x5cf   :  { %5382 = vst.msk [vmem:[#allocation11 + $0x8] sm:$0xff] %vm116_vm0, %v5378_v60 }
 0x5d0   :  { %5381 = vst.msk [vmem:[#allocation11] sm:$0xff] %vm116_vm0, %v5373_v43 }
 0x5d1   :  { %6035 = shalt.err (!%p6032_p2)
}
 0x5d2   :  { %s6036_s17 = scalar_lea.hbm %s7142_s9, 256 }
 0x5d3   :  { %p6037_p3 = scmp.ne.s32.totalorder %s7142_s9, %s6036_s17  ;;  %p6040_p4 = scmp.lt.u32.totalorder %s6036_s17, %s7142_s9 }
 0x5d5   :  { %p6042_p5 = pnand %p6040_p4, %p6037_p3 }
 0x5d7   :  { %6045 = shalt.err (!%p6042_p5)
}
 0x5d8   :  { %5394 = dma.vmem_to_hbm [thread:$0]  %s5389_s5, 256, %s7142_s9, [#allocation4], %s6056_s21, %s6056_s21, %s6057_s22  }
 0x5d9   :  { %6052 = dma.done.wait [#allocation4], 256  }
 0x5da   :  { %6053 = vsyncadd [#allocation4], 4294967040 }
 0x5db   :  { %5398 = vsyncpa [#allocation3], 1 }
 0x5dc   :  { %5399 = vsyncpa [#allocation6], 1 }
 0x5dd   :  { %5400 = vsyncpa [#allocation9], 1 }
 0x5de   :  { %5401 = vsyncpa [#allocation4], 1 }

</bundles_post_ra>
